<compile_context>
chip_gen: v7x
topology: tpu7x:2x2x1
jax: 0.10.0
libtpu: 0.0.40
codegen_flags: <defaults>
</compile_context>

<pallas_src>
import functools

import jax
import jax.numpy as jnp
from jax.experimental import pallas as pl
from jax.experimental.pallas import tpu as pltpu


def _round_up(x, m):
    return ((x + m - 1) // m) * m


def _learned_mixin_kernel(hid_ref, logit_ref, bias_ref, label_ref, w_ref, b_ref,
                          out_ref, ce_acc, ent_acc, *, penalty, inv_batch, true_b):
    shard = pl.program_id(0)
    tile = pl.program_id(1)
    n_tiles = pl.num_programs(1)

    @pl.when(tile == 0)
    def _init():
        ce_acc[...] = jnp.zeros_like(ce_acc)
        ent_acc[...] = jnp.zeros_like(ent_acc)

    hid = hid_ref[...]                                   # [tb, F]  f32, natural layout
    lg = logit_ref[...].astype(jnp.float32)              # [tb, C]  (.float() in the spec)
    bs = bias_ref[...].astype(jnp.float32)               # [tb, C]  bias log-probs
    lbl = label_ref[...]                                 # [tb, 1]  int32
    b0 = b_ref[0, 0]                                     # scalar f32 (SMEM)

    tb, n_cls = lg.shape

    # factor = softplus(hidden @ W^T + b): hidden is the moving (LHS) MXU operand, the tiny
    # [F, 128] weight slab is stationary.  Column 0 holds W; the rest are zeros.
    pre = jnp.dot(hid, w_ref[...], preferred_element_type=jnp.float32)[:, 0:1] + b0   # [tb,1]
    # Single-pass numerically stable softplus: max(x, 0) + log1p(exp(-|x|)).
    factor = jnp.maximum(pre, 0.0) + jnp.log1p(jnp.exp(-jnp.abs(pre)))                # [tb,1]

    bias_s = bs * factor                                  # [tb, C], lane-broadcast of factor

    # Entropy of softmax(bias_s) along classes: log(s) - sum(e * sh) / s.
    m_b = jnp.max(bias_s, axis=1, keepdims=True)          # [tb, 1]
    sh_b = bias_s - m_b
    e_b = jnp.exp(sh_b)                                    # [tb, C]
    s_b = jnp.sum(e_b, axis=1, keepdims=True)              # [tb, 1]
    ent_rows = (jnp.log(s_b)
                - jnp.sum(e_b * sh_b, axis=1, keepdims=True) * pl.reciprocal(s_b))    # [tb,1]

    # Cross entropy: log_softmax(log_softmax(logits) + bias_s) == log_softmax(logits + bias_s).
    z = lg + bias_s                                        # [tb, C]
    m_z = jnp.max(z, axis=1, keepdims=True)
    lse_z = m_z + jnp.log(jnp.sum(jnp.exp(z - m_z), axis=1, keepdims=True))            # [tb,1]
    cls = jax.lax.broadcasted_iota(jnp.int32, (tb, n_cls), 1)
    # TODO(synk): no ignore_index / out-of-range label handling (same as the reference).
    one_hot = (cls == lbl).astype(jnp.float32)             # labels [tb, 1] broadcast over classes
    z_at_y = jnp.sum(one_hot * z, axis=1, keepdims=True)    # [tb, 1]
    ce_rows = lse_z - z_at_y                                # [tb, 1] = -log_softmax(z)[label]

    # Mask padded tail rows (global row index >= true batch size).
    row0 = (shard * n_tiles + tile) * tb
    rows = jax.lax.broadcasted_iota(jnp.int32, (tb, 1), 0) + row0
    valid = (rows < true_b).astype(jnp.float32)

    ce_acc[...] += ce_rows * valid
    ent_acc[...] += ent_rows * valid

    @pl.when(tile == n_tiles - 1)
    def _finalize():
        ce = jnp.sum(ce_acc[...]) * inv_batch
        ent = jnp.sum(ent_acc[...]) * inv_batch
        out_ref[...] = jnp.full(out_ref.shape, ce + penalty * ent, jnp.float32)


def learned_mixin_loss(hidden, logits, bias, labels, w, b, penalty, *, block_b=2048):
    """hidden [B,F] f32, logits [B,C], bias [B,C] (log-probs), labels [B] int, w [1,F], b [1]."""
    B, F = hidden.shape
    C = logits.shape[1]

    # Batch rows sit on sublanes, so block_b only needs to be a multiple of 8.
    block_b = int(max(8, _round_up(min(block_b, _round_up(B, 8)), 8)))

    total_tiles = pl.cdiv(B, block_b)
    num_shards = 2 if total_tiles >= 2 else 1              # one shard per v7x TensorCore
    tiles_per_shard = pl.cdiv(B, num_shards * block_b)
    b_pad = num_shards * tiles_per_shard * block_b

    hidden = jnp.asarray(hidden, jnp.float32)              # natural [B, F] layout, f32
    logits = jnp.asarray(logits, jnp.float32)
    bias = jnp.asarray(bias, jnp.float32)
    labels2 = jnp.asarray(labels, jnp.int32).reshape(B, 1)
    if b_pad != B:
        pad = b_pad - B
        hidden = jnp.pad(hidden, ((0, pad), (0, 0)))
        logits = jnp.pad(logits, ((0, pad), (0, 0)))
        bias = jnp.pad(bias, ((0, pad), (0, 0)))
        labels2 = jnp.pad(labels2, ((0, pad), (0, 0)))

    # Linear(768, 1) weight as an [F, 128] slab (column 0 = W, rest zero): stationary MXU
    # operand, loaded once (constant index_map).  Bias scalar lives in SMEM.
    w_col = jnp.asarray(w, jnp.float32).reshape(F, 1)
    w_pad = jnp.pad(w_col, ((0, 0), (0, 127)))
    b_r = jnp.asarray(b, jnp.float32).reshape(1, 1)

    kernel = functools.partial(_learned_mixin_kernel, penalty=float(penalty),
                               inv_batch=1.0 / B, true_b=B)

    tile_map = lambda s, j: (s * tiles_per_shard + j, 0)    # batch-tile index for shard s
    const = lambda s, j: (0, 0)                             # resident block (loaded once)

    out = pl.pallas_call(
        kernel,
        out_shape=jax.ShapeDtypeStruct((num_shards, 1, 128), jnp.float32),
        grid=(num_shards, tiles_per_shard),
        in_specs=[
            pl.BlockSpec((block_b, F), tile_map),           # hidden (natural layout, f32)
            pl.BlockSpec((block_b, C), tile_map),           # logits
            pl.BlockSpec((block_b, C), tile_map),           # bias log-probs
            pl.BlockSpec((block_b, 1), tile_map),           # labels
            pl.BlockSpec((F, 128), const),                  # linear weight slab, resident
            pl.BlockSpec((1, 1), const, memory_space=pltpu.SMEM),   # linear bias scalar
        ],
        out_specs=pl.BlockSpec((1, 1, 128), lambda s, j: (s, 0, 0)),
        scratch_shapes=[pltpu.VMEM((block_b, 1), jnp.float32),      # CE partial sums
                        pltpu.VMEM((block_b, 1), jnp.float32)],     # entropy partial sums
        compiler_params=pltpu.CompilerParams(
            # Shard axis splits tiles across v7x's 2 TensorCores; batch-tile axis carries the
            # VMEM accumulators and is therefore "arbitrary".
            dimension_semantics=("parallel", "arbitrary"),
            vmem_limit_bytes=48 * 1024 * 1024),
    )(hidden, logits, bias, labels2, w_pad, b_r)

    # Sum the per-shard partial losses (each already divided by the true batch size).
    return jnp.sum(out[:, 0, 0])


def _reference_loss(hidden, logits, bias, labels, w, b, penalty):
    """Pure-JAX reference mirroring the PyTorch forward exactly (f32, double log_softmax)."""
    logits = logits.astype(jnp.float32)
    logits_lp = jax.nn.log_softmax(logits, axis=1)
    factor = hidden.astype(jnp.float32) @ w.reshape(-1, 1).astype(jnp.float32) + b.astype(jnp.float32)
    factor = jax.nn.softplus(factor)
    bias = bias.astype(jnp.float32) * factor
    bias_lp = jax.nn.log_softmax(bias, axis=1)
    entropy = -jnp.mean(jnp.sum(jnp.exp(bias_lp) * bias_lp, axis=1))
    z_lp = jax.nn.log_softmax(logits_lp + bias, axis=1)
    ce = -jnp.mean(jnp.take_along_axis(z_lp, labels[:, None], axis=1)[:, 0])
    return ce + penalty * entropy


if __name__ == "__main__":
    # F is fixed at 768 by the module's Linear(768, 1); B is intentionally not a multiple of
    # the tile size so the pad-and-mask path is exercised.
    B, F_DIM, C = 250, 768, 3
    penalty = 0.03

    key = jax.random.PRNGKey(0)
    k_h, k_l, k_b, k_y, k_w, k_b0 = jax.random.split(key, 6)

    hidden = jax.random.normal(k_h, (B, F_DIM), dtype=jnp.float32)
    logits = jax.random.normal(k_l, (B, C), dtype=jnp.float32)
    bias_logp = jax.nn.log_softmax(jax.random.normal(k_b, (B, C), dtype=jnp.float32), axis=1)
    labels = jax.random.randint(k_y, (B,), 0, C, dtype=jnp.int32)

    # Deterministic "Linear(768, 1)" parameters (synthetic, not a checkpoint load).
    w = jax.random.normal(k_w, (1, F_DIM), dtype=jnp.float32) * 0.02
    b = jax.random.normal(k_b0, (1,), dtype=jnp.float32) * 0.02

    # block_b=64 -> grid (2 shards x 2 tiles): exercises per-shard init/accumulate/finalize,
    # the two-shard partial-loss reduction and the padded-tail masking (250 rows -> 256).
    loss = learned_mixin_loss(hidden, logits, bias_logp, labels, w, b, penalty, block_b=64)
    loss = jax.block_until_ready(loss)

    ref = _reference_loss(hidden, logits, bias_logp, labels, w, b, penalty)
    # Everything is f32 end-to-end now; tolerance only covers MXU f32 matmul passes and the
    # tiled partial-sum order vs. the reference mean.
    assert jnp.allclose(loss, ref, rtol=2e-3, atol=2e-3), (loss, ref)

    print("KERNEL_OK")
</pallas_src>

<mosaic_0001>
module attributes {stable_mosaic.version = 11 : i64} {
  func.func @_learned_mixin_kernel(%arg0: i32, %arg1: i32, %arg2: memref<64x768xf32, #tpu.memory_space<vmem>>, %arg3: memref<64x3xf32, #tpu.memory_space<vmem>>, %arg4: memref<64x3xf32, #tpu.memory_space<vmem>>, %arg5: memref<64x1xi32, #tpu.memory_space<vmem>>, %arg6: memref<768x128xf32, #tpu.memory_space<vmem>>, %arg7: memref<1x1xf32, #tpu.memory_space<smem>>, %arg8: memref<1x1x128xf32, #tpu.memory_space<vmem>>, %arg9: memref<64x1xf32, #tpu.memory_space<vmem>>, %arg10: memref<64x1xf32, #tpu.memory_space<vmem>>) attributes {dimension_semantics = [#tpu.dimension_semantics<parallel>, #tpu.dimension_semantics<arbitrary>], iteration_bounds = array<i64: 2, 2>, scalar_prefetch = 0 : i64, scratch_operands = 2 : i64, tpu.core_type = #tpu.core_type<tc>, window_params = [{transform_indices = @transform_0, window_bounds = array<i64: 64, 768>}, {transform_indices = @transform_1, window_bounds = array<i64: 64, 3>}, {transform_indices = @transform_2, window_bounds = array<i64: 64, 3>}, {transform_indices = @transform_3, window_bounds = array<i64: 64, 1>}, {pipeline_mode = #tpu.pipeline_mode<synchronous>, transform_indices = @transform_4, window_bounds = array<i64: 768, 128>}, {transform_indices = @transform_5, window_bounds = array<i64: 1, 1>}, {transform_indices = @transform_6, window_bounds = array<i64: 1, 1, 128>}]} {
    %c0_i32 = arith.constant 0 : i32
    %0 = arith.cmpi eq, %arg1, %c0_i32 : i32
    %1 = arith.extui %0 : i1 to i32
    %c0_i32_0 = arith.constant 0 : i32
    %2 = arith.cmpi ne, %1, %c0_i32_0 : i32
    scf.if %2 {
      %cst_29 = arith.constant 0.000000e+00 : f32
      %77 = vector.broadcast %cst_29 : f32 to vector<64x1xf32>
      %c0_30 = arith.constant 0 : index
      %c0_31 = arith.constant 0 : index
      %78 = vector.load %arg9[%c0_30, %c0_31] : memref<64x1xf32, #tpu.memory_space<vmem>>, vector<64x1xf32>
      tpu.vector_store %arg9[%c0_30, %c0_31], %77 {strides = array<i32>} : memref<64x1xf32, #tpu.memory_space<vmem>>, vector<64x1xf32>,
      %cst_32 = arith.constant 0.000000e+00 : f32
      %79 = vector.broadcast %cst_32 : f32 to vector<64x1xf32>
      %c0_33 = arith.constant 0 : index
      %c0_34 = arith.constant 0 : index
      %80 = vector.load %arg10[%c0_33, %c0_34] : memref<64x1xf32, #tpu.memory_space<vmem>>, vector<64x1xf32>
      tpu.vector_store %arg10[%c0_33, %c0_34], %79 {strides = array<i32>} : memref<64x1xf32, #tpu.memory_space<vmem>>, vector<64x1xf32>,
    } else {
    }
    %c0 = arith.constant 0 : index
    %c0_1 = arith.constant 0 : index
    %3 = vector.load %arg2[%c0, %c0_1] : memref<64x768xf32, #tpu.memory_space<vmem>>, vector<64x768xf32>
    %c0_2 = arith.constant 0 : index
    %c0_3 = arith.constant 0 : index
    %4 = vector.load %arg3[%c0_2, %c0_3] : memref<64x3xf32, #tpu.memory_space<vmem>>, vector<64x3xf32>
    %c0_4 = arith.constant 0 : index
    %c0_5 = arith.constant 0 : index
    %5 = vector.load %arg4[%c0_4, %c0_5] : memref<64x3xf32, #tpu.memory_space<vmem>>, vector<64x3xf32>
    %c0_6 = arith.constant 0 : index
    %c0_7 = arith.constant 0 : index
    %6 = vector.load %arg5[%c0_6, %c0_7] : memref<64x1xi32, #tpu.memory_space<vmem>>, vector<64x1xi32>
    %c0_8 = arith.constant 0 : index
    %c0_9 = arith.constant 0 : index
    %7 = memref.load %arg7[%c0_8, %c0_9] : memref<1x1xf32, #tpu.memory_space<smem>>
    %c0_10 = arith.constant 0 : index
    %c0_11 = arith.constant 0 : index
    %8 = vector.load %arg6[%c0_10, %c0_11] : memref<768x128xf32, #tpu.memory_space<vmem>>, vector<768x128xf32>
    %cst = arith.constant dense<0.000000e+00> : vector<64x128xf32>
    %9 = tpu.matmul %3, %8, %cst {dimension_numbers = #tpu.dot_dimension_numbers<[1], [0], [0], [1], [0, 0, 1, 1], [], []>} : vector<64x768xf32>, vector<768x128xf32>, vector<64x128xf32> -> vector<64x128xf32>
    %10 = vector.extract_strided_slice %9 {offsets = [0, 0], sizes = [64, 1], strides = [1, 1]} : vector<64x128xf32> to vector<64x1xf32>
    %11 = vector.broadcast %7 : f32 to vector<64x1xf32>
    %12 = arith.addf %10, %11 : vector<64x1xf32>
    %cst_12 = arith.constant 0.000000e+00 : f32
    %13 = vector.broadcast %cst_12 : f32 to vector<64x1xf32>
    %14 = arith.maximumf %12, %13 : vector<64x1xf32>
    %15 = math.absf %12 : vector<64x1xf32>
    %cst_13 = arith.constant 0.000000e+00 : f32
    %16 = vector.broadcast %cst_13 : f32 to vector<64x1xf32>
    %17 = arith.subf %16, %15 : vector<64x1xf32>
    %18 = math.exp %17 : vector<64x1xf32>
    %19 = math.log1p %18 : vector<64x1xf32>
    %20 = arith.addf %14, %19 : vector<64x1xf32>
    %21 = vector.broadcast %20 : vector<64x1xf32> to vector<64x3xf32>
    %22 = arith.mulf %5, %21 : vector<64x3xf32>
    %cst_14 = arith.constant dense<0xFF800000> : vector<64xf32>
    %23 = vector.multi_reduction <maximumf>, %22, %cst_14 [1] : vector<64x3xf32> to vector<64xf32>
    %24 = vector.shape_cast %23 : vector<64xf32> to vector<64x1xf32>
    %25 = vector.broadcast %24 : vector<64x1xf32> to vector<64x3xf32>
    %26 = arith.subf %22, %25 : vector<64x3xf32>
    %27 = math.exp %26 : vector<64x3xf32>
    %cst_15 = arith.constant dense<0.000000e+00> : vector<64xf32>
    %28 = vector.multi_reduction <add>, %27, %cst_15 [1] : vector<64x3xf32> to vector<64xf32>
    %29 = vector.shape_cast %28 : vector<64xf32> to vector<64x1xf32>
    %30 = math.log %29 : vector<64x1xf32>
    %31 = arith.mulf %27, %26 : vector<64x3xf32>
    %cst_16 = arith.constant dense<0.000000e+00> : vector<64xf32>
    %32 = vector.multi_reduction <add>, %31, %cst_16 [1] : vector<64x3xf32> to vector<64xf32>
    %33 = vector.shape_cast %32 : vector<64xf32> to vector<64x1xf32>
    %34 = tpu.reciprocal %29 : vector<64x1xf32> -> vector<64x1xf32>
    %35 = arith.mulf %33, %34 : vector<64x1xf32>
    %36 = arith.subf %30, %35 : vector<64x1xf32>
    %37 = arith.addf %4, %22 : vector<64x3xf32>
    %cst_17 = arith.constant dense<0xFF800000> : vector<64xf32>
    %38 = vector.multi_reduction <maximumf>, %37, %cst_17 [1] : vector<64x3xf32> to vector<64xf32>
    %39 = vector.shape_cast %38 : vector<64xf32> to vector<64x1xf32>
    %40 = vector.broadcast %39 : vector<64x1xf32> to vector<64x3xf32>
    %41 = arith.subf %37, %40 : vector<64x3xf32>
    %42 = math.exp %41 : vector<64x3xf32>
    %cst_18 = arith.constant dense<0.000000e+00> : vector<64xf32>
    %43 = vector.multi_reduction <add>, %42, %cst_18 [1] : vector<64x3xf32> to vector<64xf32>
    %44 = vector.shape_cast %43 : vector<64xf32> to vector<64x1xf32>
    %45 = math.log %44 : vector<64x1xf32>
    %46 = arith.addf %39, %45 : vector<64x1xf32>
    %47 = tpu.iota {dimensions = array<i32: 1>} : vector<64x3xi32>
    %48 = vector.broadcast %6 : vector<64x1xi32> to vector<64x3xi32>
    %49 = arith.cmpi eq, %47, %48 : vector<64x3xi32>
    %50 = arith.extui %49 : vector<64x3xi1> to vector<64x3xi32>
    %51 = arith.sitofp %50 : vector<64x3xi32> to vector<64x3xf32>
    %52 = arith.mulf %51, %37 : vector<64x3xf32>
    %cst_19 = arith.constant dense<0.000000e+00> : vector<64xf32>
    %53 = vector.multi_reduction <add>, %52, %cst_19 [1] : vector<64x3xf32> to vector<64xf32>
    %54 = vector.shape_cast %53 : vector<64xf32> to vector<64x1xf32>
    %55 = arith.subf %46, %54 : vector<64x1xf32>
    %c2_i32 = arith.constant 2 : i32
    %56 = arith.muli %arg0, %c2_i32 : i32
    %57 = arith.addi %56, %arg1 : i32
    %c64_i32 = arith.constant 64 : i32
    %58 = arith.muli %57, %c64_i32 : i32
    %59 = tpu.iota {dimensions = array<i32: 0>} : vector<64x1xi32>
    %60 = vector.broadcast %58 : i32 to vector<64x1xi32>
    %61 = arith.addi %59, %60 : vector<64x1xi32>
    %c250_i32 = arith.constant 250 : i32
    %62 = vector.broadcast %c250_i32 : i32 to vector<64x1xi32>
    %63 = arith.cmpi slt, %61, %62 : vector<64x1xi32>
    %64 = arith.extui %63 : vector<64x1xi1> to vector<64x1xi32>
    %65 = arith.sitofp %64 : vector<64x1xi32> to vector<64x1xf32>
    %c0_20 = arith.constant 0 : index
    %c0_21 = arith.constant 0 : index
    %66 = vector.load %arg9[%c0_20, %c0_21] : memref<64x1xf32, #tpu.memory_space<vmem>>, vector<64x1xf32>
    %67 = arith.mulf %55, %65 : vector<64x1xf32>
    %68 = arith.addf %66, %67 : vector<64x1xf32>
    %c0_22 = arith.constant 0 : index
    %c0_23 = arith.constant 0 : index
    %69 = vector.load %arg9[%c0_22, %c0_23] : memref<64x1xf32, #tpu.memory_space<vmem>>, vector<64x1xf32>
    tpu.vector_store %arg9[%c0_22, %c0_23], %68 {strides = array<i32>} : memref<64x1xf32, #tpu.memory_space<vmem>>, vector<64x1xf32>,
    %c0_24 = arith.constant 0 : index
    %c0_25 = arith.constant 0 : index
    %70 = vector.load %arg10[%c0_24, %c0_25] : memref<64x1xf32, #tpu.memory_space<vmem>>, vector<64x1xf32>
    %71 = arith.mulf %36, %65 : vector<64x1xf32>
    %72 = arith.addf %70, %71 : vector<64x1xf32>
    %c0_26 = arith.constant 0 : index
    %c0_27 = arith.constant 0 : index
    %73 = vector.load %arg10[%c0_26, %c0_27] : memref<64x1xf32, #tpu.memory_space<vmem>>, vector<64x1xf32>
    tpu.vector_store %arg10[%c0_26, %c0_27], %72 {strides = array<i32>} : memref<64x1xf32, #tpu.memory_space<vmem>>, vector<64x1xf32>,
    %c1_i32 = arith.constant 1 : i32
    %74 = arith.cmpi eq, %arg1, %c1_i32 : i32
    %75 = arith.extui %74 : i1 to i32
    %c0_i32_28 = arith.constant 0 : i32
    %76 = arith.cmpi ne, %75, %c0_i32_28 : i32
    scf.if %76 {
      %c0_29 = arith.constant 0 : index
      %c0_30 = arith.constant 0 : index
      %77 = vector.load %arg9[%c0_29, %c0_30] : memref<64x1xf32, #tpu.memory_space<vmem>>, vector<64x1xf32>
      %78 = vector.shape_cast %77 : vector<64x1xf32> to vector<1x64x1xf32>
      %cst_31 = arith.constant dense<0.000000e+00> : vector<1xf32>
      %79 = vector.multi_reduction <add>, %78, %cst_31 [1, 2] : vector<1x64x1xf32> to vector<1xf32>
      %80 = vector.shape_cast %79 : vector<1xf32> to vector<1x1x1xf32>
      %81 = vector.extract %80[0, 0, 0] : f32 from vector<1x1x1xf32>
      %cst_32 = arith.constant 4.000000e-03 : f32
      %82 = arith.mulf %81, %cst_32 : f32
      %c0_33 = arith.constant 0 : index
      %c0_34 = arith.constant 0 : index
      %83 = vector.load %arg10[%c0_33, %c0_34] : memref<64x1xf32, #tpu.memory_space<vmem>>, vector<64x1xf32>
      %84 = vector.shape_cast %83 : vector<64x1xf32> to vector<1x64x1xf32>
      %cst_35 = arith.constant dense<0.000000e+00> : vector<1xf32>
      %85 = vector.multi_reduction <add>, %84, %cst_35 [1, 2] : vector<1x64x1xf32> to vector<1xf32>
      %86 = vector.shape_cast %85 : vector<1xf32> to vector<1x1x1xf32>
      %87 = vector.extract %86[0, 0, 0] : f32 from vector<1x1x1xf32>
      %cst_36 = arith.constant 4.000000e-03 : f32
      %88 = arith.mulf %87, %cst_36 : f32
      %cst_37 = arith.constant 3.000000e-02 : f32
      %89 = arith.mulf %cst_37, %88 : f32
      %90 = arith.addf %82, %89 : f32
      %91 = vector.broadcast %90 : f32 to vector<1x1x128xf32>
      %c0_38 = arith.constant 0 : index
      %c0_39 = arith.constant 0 : index
      %c0_40 = arith.constant 0 : index
      %92 = vector.load %arg8[%c0_38, %c0_39, %c0_40] : memref<1x1x128xf32, #tpu.memory_space<vmem>>, vector<1x1x128xf32>
      tpu.vector_store %arg8[%c0_38, %c0_39, %c0_40], %91 {strides = array<i32>} : memref<1x1x128xf32, #tpu.memory_space<vmem>>, vector<1x1x128xf32>,
    } else {
    }
    return
  }
  func.func @transform_0(%arg0: i32, %arg1: i32) -> (i32, i32) {
    %c2_i32 = arith.constant 2 : i32
    %0 = arith.muli %arg0, %c2_i32 : i32
    %1 = arith.addi %0, %arg1 : i32
    %c0_i32 = arith.constant 0 : i32
    %c0_i32_0 = arith.constant 0 : i32
    return %1, %c0_i32 : i32, i32
  }
  func.func @transform_1(%arg0: i32, %arg1: i32) -> (i32, i32) {
    %c2_i32 = arith.constant 2 : i32
    %0 = arith.muli %arg0, %c2_i32 : i32
    %1 = arith.addi %0, %arg1 : i32
    %c0_i32 = arith.constant 0 : i32
    %c0_i32_0 = arith.constant 0 : i32
    return %1, %c0_i32 : i32, i32
  }
  func.func @transform_2(%arg0: i32, %arg1: i32) -> (i32, i32) {
    %c2_i32 = arith.constant 2 : i32
    %0 = arith.muli %arg0, %c2_i32 : i32
    %1 = arith.addi %0, %arg1 : i32
    %c0_i32 = arith.constant 0 : i32
    %c0_i32_0 = arith.constant 0 : i32
    return %1, %c0_i32 : i32, i32
  }
  func.func @transform_3(%arg0: i32, %arg1: i32) -> (i32, i32) {
    %c2_i32 = arith.constant 2 : i32
    %0 = arith.muli %arg0, %c2_i32 : i32
    %1 = arith.addi %0, %arg1 : i32
    %c0_i32 = arith.constant 0 : i32
    %c0_i32_0 = arith.constant 0 : i32
    return %1, %c0_i32 : i32, i32
  }
  func.func @transform_4(%arg0: i32, %arg1: i32) -> (i32, i32) {
    %c0_i32 = arith.constant 0 : i32
    %c0_i32_0 = arith.constant 0 : i32
    %c0_i32_1 = arith.constant 0 : i32
    return %c0_i32, %c0_i32_0 : i32, i32
  }
  func.func @transform_5(%arg0: i32, %arg1: i32) -> (i32, i32) {
    %c0_i32 = arith.constant 0 : i32
    %c0_i32_0 = arith.constant 0 : i32
    %c0_i32_1 = arith.constant 0 : i32
    return %c0_i32, %c0_i32_0 : i32, i32
  }
  func.func @transform_6(%arg0: i32, %arg1: i32) -> (i32, i32, i32) {
    %c0_i32 = arith.constant 0 : i32
    %c0_i32_0 = arith.constant 0 : i32
    %c0_i32_1 = arith.constant 0 : i32
    return %arg0, %c0_i32, %c0_i32_0 : i32, i32, i32
  }
}

</mosaic_0001>

<bundles_post_ra>
// kernel: tpu_custom_call.1
= control target key start
LH: loop header
LB: loop body
LE: loop exit
PB: predicated region body
PF: predicated region fallthrough
CT: control target
= control target key end

     0   :  { %s3489_s0 = inlined_call_operand.hbm [shape: f32[256,768], index: 0, kind: input, shape index: {}]   ;;  %s3490_s1 = inlined_call_operand.vmem [shape: f32[256,3], index: 1, kind: input, shape index: {}]   ;;  %s3491_s2 = inlined_call_operand.vmem [shape: f32[256,3], index: 2, kind: input, shape index: {}]   ;;  %s3492_s3 = inlined_call_operand.vmem [shape: s32[256,1], index: 3, kind: input, shape index: {}]   ;;  %s3493_s4 = inlined_call_operand.vmem [shape: f32[768,128], index: 4, kind: input, shape index: {}]   ;;  %s3494_s5 = inlined_call_operand.<no memory space> [shape: f32[1,1], index: 5, kind: input, shape index: {}]   ;;  %s3495_s6 = inlined_call_operand.hbm [shape: f32[2,1,128], index: 6, kind: output, shape index: {}]  }
   0x1   :  { %3502 = sst [smem:[#allocation16_spill]] %s3489_s0 }
   0x2   :  { %3503 = sst [smem:[#allocation17_spill]] %s3490_s1 }
   0x3   :  { %3504 = sst [smem:[#allocation18_spill]] %s3491_s2 }
   0x4   :  { %3505 = sst [smem:[#allocation19_spill]] %s3492_s3 }
   0x5   :  { %11 = sst [smem:[#allocation4]] %s3494_s5 }
   0x6   :  { %12 = vsyncpa [#allocation6], 0 }
   0x7   :  { %14 = vsyncpa [#allocation6 + $0x1], 0 }
   0x8   :  { %15 = vsyncpa [#allocation7], 0 }
   0x9   :  { %17 = vsyncpa [#allocation7 + $0x1], 0  ;;  %s2489_s23 = smov 0   ;;  %s2491_s24 = smov 0  }
   0xa   :  { %s2493_s25 = smov 0   ;;  %s2495_s26 = smov 0  }
   0xb   :  { %s2497_s27 = smov 0   ;;  %s2499_s28 = smov 0  }
   0xc   :  { %s2501_s29 = smov 0   ;;  %s2503_s30 = smov 0  }
   0xd   :  { %s2505_s5 = smov 0   ;;  %s2507_s7 = smov 0  }
   0xe   :  { %s2509_s8 = smov 0  }
   0xf LB: > { %3506 = sst [smem:[#allocation11_spill]] %s2434_s5  ;;  %s1733_s9 = sadd.s32 4294967295, %s2442_s8   ;;  %s2442_s8 = sphi %s2509_s8, %s23_s8   ;;  %s2438_s7 = sphi %s2507_s7, %s3536_s7   ;;  %s2434_s5 = sphi %s2505_s5, %s3535_s5   ;;  %s2430_s30 = sphi %s2503_s30, %s3534_s30   ;;  %s2426_s29 = sphi %s2501_s29, %s3533_s29   ;;  %s2422_s28 = sphi %s2499_s28, %s3542_s28   ;;  %s2418_s27 = sphi %s2497_s27, %s3541_s27   ;;  %s2414_s26 = sphi %s2495_s26, %s3540_s26   ;;  %s2410_s25 = sphi %s2493_s25, %s3539_s25   ;;  %s2406_s24 = sphi %s2491_s24, %s3538_s24   ;;  %s2402_s23 = sphi %s2489_s23, %s3537_s23  }
  0x10   : > { %3507 = sst [smem:[#allocation12_spill]] %s2438_s7  ;;  %s32_s11 = sadd.s32 1, %s2434_s5 }
  0x11   : > { %s35_s12 = sadd.s32 1, %s2438_s7  ;;  %p33_p0 = scmp.ge.s32.totalorder %s32_s11, 2 }
  0x12   : > { %s1735_s13 = sshll.u32 %s2438_s7, 1  ;;  %s46_s15 = sadd.s32 1, %s2422_s28 }
  0x13   : > { %s2548_s14 = sadd.s32 %s2434_s5, %s1735_s13  ;;  %s3544_s11 = smov (%p33_p0, %s32_s11), 0 }
  0x14   : > { %3508 = sst [smem:[#allocation13_spill]] %s3544_s11  ;;  %s3546_s12 = smov (!%p33_p0, %s35_s12), %s2438_s7 }
  0x15   : > { %p53_p1 = scmp.ne.s32.totalorder %s2422_s28, %s2418_s27  ;;  %p54_p2 = scmp.eq.s32.totalorder %s2442_s8, 0 }
  0x16   : > { %p37_p3 = scmp.ge.s32.totalorder %s3546_s12, 2  ;;  %p59_p4 = scmp.ne.s32.totalorder %s2418_s27, %s2414_s26 }
  0x17   : > { %p2558_p5 = por %p54_p2, %p53_p1  ;;  %p60_p6 = scmp.eq.s32.totalorder %s1733_s9, 0 }
  0x18   : > { %s3548_s12 = smov (%p37_p3, %s3546_s12), 0  ;;  %s204_s18 = sadd.s32 1, %s2410_s25 }
  0x19   : > { %3510 = sst [smem:[#allocation14_spill]] %s3548_s12  ;;  %p2564_p7 = por %p60_p6, %p59_p4 }
  0x1a   : > { %s1736_s19 = sshll.u32 %s3548_s12, 1  ;;  %s201_s20 = ssub.s32 %s2438_s7, %s3548_s12 }
  0x1b   : > { %s42_s21 = sadd.s32 %s1736_s19, %s3544_s11  ;;  %p202_p8 = scmp.eq.s32.totalorder %s201_s20, 0 }
  0x1c   : > { %s43_s22 = ssub.s32 %s2548_s14, %s42_s21  ;;  %p214_p9 = scmp.ne.s32.totalorder %s2410_s25, %s2406_s24 }
  0x1d   : > { %p44_p10 = scmp.eq.s32.totalorder %s43_s22, 0  ;;  %p215_p11 = scmp.eq.s32.totalorder %s1733_s9, 3 }
  0x1e   : > { %s2577_s26 = scalar_select %p202_p8, %s2410_s25, %s204_s18  }
  0x1f   : > { %s2580_s13 = scalar_select %p44_p10, %s2422_s28, %s46_s15  }
  0x20   : > { %p2582_p12 = por %p215_p11, %p214_p9  ;;  %p220_p13 = scmp.ne.s32.totalorder %s2406_s24, %s2402_s23 }
  0x21   : > { %3512 = sst [smem:[#allocation15_spill]] %s2580_s13  ;;  %s3514_s5 = sadd.s32 4294967294, %s2442_s8  }
  0x22   : > { %s3513_s10 = scalar_select %p2582_p12, 1, 0 }
  0x23   : > { %p221_p0 = scmp.eq.s32.totalorder %s3514_s5, 3  ;;  %p2081_p1 = scmp.lt.s32.totalorder %s2442_s8, 4 }
  0x24   : > { %s247_s12 = sand.u32 1, %s2422_s28   ;;  %s2063_s15 = smul.u32 6144, %s2548_s14 }
  0x25   : > { %p2592_p2 = por %p221_p0, %p220_p13  ;;  %s2062_s20 = smul.u32 384, %s247_s12 }
  0x26   : > { %p2598_p3 = pnand %p2081_p1, %p2558_p5  ;;  %s3517_s0 = sld [smem:[#allocation16_spill]] }
  0x27   : > { %s3515_s19 = scalar_select %p2592_p2, 1, 0 }
  0x28   : > { %s251_s5 = scalar_lea.vmem [#allocation5], %s2062_s20  ;;  %s2610_s16 = scalar_lea.sflag [#allocation6], %s247_s12 }
  0x29   : > { %s261_s11 = sshll.u32 %s251_s5, 4  ;;  %p2292_p5 = pneg %p2598_p3  ;;  %s2608_s11 = int_to_ptr.vmem [resolvable:$true] %s261_s11 }
  0x2c   : > { %s2606_s22 = scalar_lea.hbm %s3517_s0, %s2063_s15  ;;  %s2295_s18 = scalar_lea.hbm %s3517_s0, 24576 }
  0x2d   : > { %s2290_s7 = scalar_lea.hbm %s2606_s22, 6144  ;;  %p2296_p9 = scmp.lt.u32.totalorder %s2606_s22, %s3517_s0 }
  0x2e   : > { %p2291_p4 = scmp.ne.s32.totalorder %s2606_s22, %s2290_s7  ;;  %p2297_p10 = scmp.lt.u32.totalorder %s2295_s18, %s2290_s7 }
  0x2f   : > { %p2299_p13 = scmp.lt.u32.totalorder %s2290_s7, %s2606_s22 }
  0x30   : > { %p2293_p6 = pnand %p2292_p5, %p2291_p4  ;;  %p2298_p11 = por %p2297_p10, %p2296_p9 }
  0x32   : > { %p2294_p8 = pneg %p2293_p6  ;;  %p2300_p0 = por %p2299_p13, %p2298_p11 }
  0x34   : > { %p2301_p1 = pnand %p2300_p0, %p2294_p8 }
  0x36   : > { %2304 = shalt.err (!%p2301_p1)
}
  0x37   : > { %s2305_s12 = scalar_lea.vmem %s2608_s11, 6144  ;;  %s2444_s20 = smov [#allocation5]  }
  0x38   : > { %p2306_p4 = scmp.ne.s32.totalorder %s2608_s11, %s2305_s12  ;;  %s2310_s5 = sshll.u32 %s2444_s20, 4  ;;  %s2311_s5 = int_to_ptr.vmem [resolvable:$false] %s2310_s5 }
  0x39   : > { %s2312_s13 = scalar_lea.vmem %s2311_s5, 12288  ;;  %p2313_p12 = scmp.lt.s32.totalorder %s2608_s11, %s2311_s5 }
  0x3a   : > { %p2308_p6 = pnand %p2306_p4, %p2292_p5  ;;  %p2314_p9 = scmp.lt.s32.totalorder %s2312_s13, %s2305_s12 }
  0x3c   : > { %p2309_p2 = pneg %p2308_p6  ;;  %p2315_p10 = por %p2314_p9, %p2313_p12 }
  0x3e   : > { %p2316_p11 = pnand %p2315_p10, %p2309_p2 }
  0x40   : > { %2319 = shalt.err (!%p2316_p11)
}
  0x41   : > { %s2445_s7 = smov 768   ;;  %s2446_s14 = smov 48  }
  0x42   : > { %2076 = dma.hbm_to_vmem [thread:$0]  (!%p2598_p3), %s2606_s22, 6144, %s2608_s11, %s2610_s16, %s2445_s7, %s2445_s7, %s2446_s14  }
  0x43   : > { %p1749_p5 = scmp.ge.s32.totalorder %s2442_s8, 1  ;;  %p308_p8 = scmp.lt.s32.totalorder %s2442_s8, 5 }
  0x45   : > { %p309_p13 = pnand %p1749_p5, %p308_p8 }
  0x46   : > { %s314_s15 = sand.u32 (!%p309_p13), 1, %s2418_s27  }
  0x47   : > { %312 = sbr.rel (%p309_p13) target bundleno = 1170 (0x492), region = 44  ;;  %s315_s21 = scalar_lea.sflag (!%p309_p13), [#allocation6], %s314_s15 }
  0x48   : > { %s2064_s18 = smul.u32 (!%p309_p13), 384, %s314_s15 }
  0x4a   : > { %s2641_s12 = scalar_lea.vmem (!%p309_p13), [#allocation5], %s2064_s18 }
  0x4e   : > { %2393 = dma.done.wait (%p2564_p7), %s315_s21, 6144  }
  0x4f   : > { %2395 = vsyncadd (%p2564_p7), %s315_s21, 4294961152  ;;  %s3501_s11 = sand.u32 1, %s2406_s24   ;;  %s1750_s9 = sshll.u32 %s2430_s30, 1 }
  0x50   : > { %s2650_s22 = sadd.s32 %s2426_s29, %s1750_s9  ;;  %s3518_s1 = sld [smem:[#allocation17_spill]] }
  0x51   : > { %s1751_s16 = sshll.u32 %s2650_s22, 3  ;;  %s3519_s2 = sld [smem:[#allocation18_spill]] }
  0x52   : > { %p373_p12 = scmp.lt.s32.totalorder %s1751_s16, 31  ;;  %s3520_s3 = sld [smem:[#allocation19_spill]] }
  0x53   : > { %s2670_s0 = scalar_lea.vmem [#allocation8], %s3501_s11  ;;  %p1759_p7 = scmp.ne.s32.totalorder %s2426_s29, 0 }
  0x54   : > { %s3550_s16 = smov (!%p373_p12, %s1751_s16), 31  ;;  %vm404_vm0 = vcmask (!%p1759_p7), 7168   ;;  %v2447_v0 = vmov (!%p1759_p7), 0.0  }
  0x55   : > { %s1752_s20 = sshll.u32 %s3550_s16, 3  ;;  %403 = sbr.rel (%p1759_p7) target bundleno = 93 (0x5d), region = 52  ;;  %405 = vst.msk [vmem:[#allocation2] sm:$0xff] (!%p1759_p7), %vm404_vm0, %v2447_v0  ;;  %406 = vst.msk [vmem:[#allocation2 + $0x8] sm:$0xff] (!%p1759_p7), %vm404_vm0, %v2447_v0 }
  0x56   : > { %s2656_s7 = scalar_lea.vmem %s3518_s1, %s1752_s20  ;;  %407 = vst.msk [vmem:[#allocation2 + $0x10] sm:$0xff] (!%p1759_p7), %vm404_vm0, %v2447_v0  ;;  %408 = vst.msk [vmem:[#allocation2 + $0x18] sm:$0xff] (!%p1759_p7), %vm404_vm0, %v2447_v0 }
  0x57   : > { %s2661_s15 = scalar_lea.vmem %s3519_s2, %s1752_s20  ;;  %409 = vst.msk [vmem:[#allocation2 + $0x20] sm:$0xff] (!%p1759_p7), %vm404_vm0, %v2447_v0  ;;  %410 = vst.msk [vmem:[#allocation2 + $0x28] sm:$0xff] (!%p1759_p7), %vm404_vm0, %v2447_v0 }
  0x58   : > { %s2666_s9 = scalar_lea.vmem %s3520_s3, %s1752_s20  ;;  %411 = vst.msk [vmem:[#allocation2 + $0x30] sm:$0xff] (!%p1759_p7), %vm404_vm0, %v2447_v0  ;;  %412 = vst.msk [vmem:[#allocation2 + $0x38] sm:$0xff] (!%p1759_p7), %vm404_vm0, %v2447_v0 }
  0x59   : > { %413 = vst.msk [vmem:[#allocation3] sm:$0xff] (!%p1759_p7), %vm404_vm0, %v2447_v0  ;;  %414 = vst.msk [vmem:[#allocation3 + $0x8] sm:$0xff] (!%p1759_p7), %vm404_vm0, %v2447_v0 }
  0x5a   : > { %415 = vst.msk [vmem:[#allocation3 + $0x10] sm:$0xff] (!%p1759_p7), %vm404_vm0, %v2447_v0  ;;  %416 = vst.msk [vmem:[#allocation3 + $0x18] sm:$0xff] (!%p1759_p7), %vm404_vm0, %v2447_v0 }
  0x5b   : > { %417 = vst.msk [vmem:[#allocation3 + $0x20] sm:$0xff] (!%p1759_p7), %vm404_vm0, %v2447_v0  ;;  %418 = vst.msk [vmem:[#allocation3 + $0x28] sm:$0xff] (!%p1759_p7), %vm404_vm0, %v2447_v0 }
  0x5c   : > { %419 = vst.msk [vmem:[#allocation3 + $0x30] sm:$0xff] %vm404_vm0, %v2447_v0  ;;  %420 = vst.msk [vmem:[#allocation3 + $0x38] sm:$0xff] %vm404_vm0, %v2447_v0 }
  0x5d PF: > { %v510_v1 = vld [vmem:[%s3493_s4 + $0x80] sm:$0xff]  ;;  %v511_v2 = vld [vmem:[%s3493_s4 + $0x88] sm:$0xff]  ;;  %v512_v12 = vld [vmem:[%s3493_s4 + $0x90] sm:$0xff]  ;;  %vm1082_vm9 = vcmask 23552   ;;  %p1778_p2 = scmp.ne.s32.totalorder %s2426_s29, 1 }
  0x5e   : > { %v542_v3 = vld [vmem:[%s3493_s4 + $0x180] sm:$0xff]  ;;  %v1950_v4 = vpack.c.bf16 %v511_v2, %v510_v1  ;;  %v543_v5 = vld [vmem:[%s3493_s4 + $0x188] sm:$0xff]  ;;  %v513_v14 = vld [vmem:[%s3493_s4 + $0x98] sm:$0xff] }
  0x5f   : > { %v494_v6 = vld [vmem:[%s3493_s4] sm:$0xff]  ;;  %v495_v7 = vld [vmem:[%s3493_s4 + $0x8] sm:$0xff]  ;;  %v1982_v8 = vpack.c.bf16 %v543_v5, %v542_v3  ;;  %v544_v15 = vld [vmem:[%s3493_s4 + $0x190] sm:$0xff]  ;;  %v1954_v17 = vpack.c.bf16 %v513_v14, %v512_v12 }
  0x60   : > { %v1952_v9 = vpack.c.bf16 %v495_v7, %v494_v6  ;;  %v526_v10 = vld [vmem:[%s3493_s4 + $0x100] sm:$0xff]  ;;  %v527_v11 = vld [vmem:[%s3493_s4 + $0x108] sm:$0xff]  ;;  %1951 = vmatprep.subr.bf16.mxu0 %v1950_v4  ;;  %v545_v16 = vld [vmem:[%s3493_s4 + $0x198] sm:$0xff] }
  0x61   : > { %v1984_v13 = vpack.c.bf16 %v527_v11, %v526_v10  ;;  %1983 = vmatprep.subr.bf16.mxu1 %v1982_v8  ;;  %v1986_v18 = vpack.c.bf16 %v545_v16, %v544_v15  ;;  %v496_v19 = vld [vmem:[%s3493_s4 + $0x10] sm:$0xff]  ;;  %v497_v20 = vld [vmem:[%s3493_s4 + $0x18] sm:$0xff]  ;;  %v514_v24 = vld [vmem:[%s3493_s4 + $0xa0] sm:$0xff] }
  0x62   : > { %1953 = vmatpush3.bf16.msra.mxu0 %v1952_v9  ;;  %v528_v21 = vld [vmem:[%s3493_s4 + $0x110] sm:$0xff]  ;;  %v1956_v22 = vpack.c.bf16 %v497_v20, %v496_v19  ;;  %v529_v23 = vld [vmem:[%s3493_s4 + $0x118] sm:$0xff]  ;;  %v515_v25 = vld [vmem:[%s3493_s4 + $0xa8] sm:$0xff] }
  0x63   : > { %1985 = vmatpush3.bf16.msra.mxu1 %v1984_v13  ;;  %1955 = vmatprep.subr.bf16.mxu0 %v1954_v17  ;;  %v1988_v26 = vpack.c.bf16 %v529_v23, %v528_v21  ;;  %v1958_v27 = vpack.c.bf16 %v515_v25, %v514_v24  ;;  %v546_v28 = vld [vmem:[%s3493_s4 + $0x1a0] sm:$0xff]  ;;  %v547_v29 = vld [vmem:[%s3493_s4 + $0x1a8] sm:$0xff]  ;;  %v516_v36 = vld [vmem:[%s3493_s4 + $0xb0] sm:$0xff] }
  0x64   : > { %1987 = vmatprep.subr.bf16.mxu1 %v1986_v18  ;;  %v498_v30 = vld [vmem:[%s3493_s4 + $0x20] sm:$0xff]  ;;  %v1990_v31 = vpack.c.bf16 %v547_v29, %v546_v28  ;;  %v499_v32 = vld [vmem:[%s3493_s4 + $0x28] sm:$0xff]  ;;  %v517_v37 = vld [vmem:[%s3493_s4 + $0xb8] sm:$0xff] }
  0x65   : > { %v530_v33 = vld [vmem:[%s3493_s4 + $0x120] sm:$0xff]  ;;  %v531_v34 = vld [vmem:[%s3493_s4 + $0x128] sm:$0xff]  ;;  %v1960_v35 = vpack.c.bf16 %v499_v32, %v498_v30  ;;  %v548_v38 = vld [vmem:[%s3493_s4 + $0x1b0] sm:$0xff]  ;;  %v1962_v40 = vpack.c.bf16 %v517_v37, %v516_v36 }
  0x66   : > { %1957 = vmatpush3.bf16.msra.mxu0 %v1956_v22  ;;  %v1992_v39 = vpack.c.bf16 %v531_v34, %v530_v33  ;;  %v549_v41 = vld [vmem:[%s3493_s4 + $0x1b8] sm:$0xff]  ;;  %v500_v42 = vld [vmem:[%s3493_s4 + $0x30] sm:$0xff]  ;;  %v518_v47 = vld [vmem:[%s3493_s4 + $0xc0] sm:$0xff] }
  0x67   : > { %1989 = vmatpush3.bf16.msra.mxu1 %v1988_v26  ;;  %1959 = vmatprep.subr.bf16.mxu0 %v1958_v27  ;;  %v501_v43 = vld [vmem:[%s3493_s4 + $0x38] sm:$0xff]  ;;  %v1994_v44 = vpack.c.bf16 %v549_v41, %v548_v38  ;;  %v532_v45 = vld [vmem:[%s3493_s4 + $0x130] sm:$0xff]  ;;  %v519_v48 = vld [vmem:[%s3493_s4 + $0xc8] sm:$0xff] }
  0x68   : > { %1991 = vmatprep.subr.bf16.mxu1 %v1990_v31  ;;  %v533_v46 = vld [vmem:[%s3493_s4 + $0x138] sm:$0xff]  ;;  %v550_v49 = vld [vmem:[%s3493_s4 + $0x1c0] sm:$0xff]  ;;  %v551_v50 = vld [vmem:[%s3493_s4 + $0x1c8] sm:$0xff]  ;;  %v1964_v51 = vpack.c.bf16 %v501_v43, %v500_v42  ;;  %v1966_v53 = vpack.c.bf16 %v519_v48, %v518_v47 }
  0x69   : > { %v1996_v52 = vpack.c.bf16 %v533_v46, %v532_v45  ;;  %v502_v54 = vld [vmem:[%s3493_s4 + $0x40] sm:$0xff]  ;;  %v503_v55 = vld [vmem:[%s3493_s4 + $0x48] sm:$0xff]  ;;  %v1998_v57 = vpack.c.bf16 %v551_v50, %v550_v49  ;;  %v520_v59 = vld [vmem:[%s3493_s4 + $0xd0] sm:$0xff] }
  0x6a   : > { %1961 = vmatpush3.bf16.msra.mxu0 %v1960_v35  ;;  %v534_v56 = vld [vmem:[%s3493_s4 + $0x140] sm:$0xff]  ;;  %v535_v58 = vld [vmem:[%s3493_s4 + $0x148] sm:$0xff]  ;;  %v521_v60 = vld [vmem:[%s3493_s4 + $0xd8] sm:$0xff]  ;;  %v1968_v63 = vpack.c.bf16 %v503_v55, %v502_v54 }
  0x6b   : > { %1993 = vmatpush3.bf16.msra.mxu1 %v1992_v39  ;;  %1963 = vmatprep.subr.bf16.mxu0 %v1962_v40  ;;  %v552_v61 = vld [vmem:[%s3493_s4 + $0x1d0] sm:$0xff]  ;;  %v553_v62 = vld [vmem:[%s3493_s4 + $0x1d8] sm:$0xff]  ;;  %v2000_v0 = vpack.c.bf16 %v535_v58, %v534_v56  ;;  %v1970_v1 = vpack.c.bf16 %v521_v60, %v520_v59  ;;  %v522_v7 = vld [vmem:[%s3493_s4 + $0xe0] sm:$0xff] }
  0x6c   : > { %1995 = vmatprep.subr.bf16.mxu1 %v1994_v44  ;;  %v504_v2 = vld [vmem:[%s3493_s4 + $0x50] sm:$0xff]  ;;  %v505_v3 = vld [vmem:[%s3493_s4 + $0x58] sm:$0xff]  ;;  %v2002_v5 = vpack.c.bf16 %v553_v62, %v552_v61  ;;  %v523_v8 = vld [vmem:[%s3493_s4 + $0xe8] sm:$0xff] }
  0x6d   : > { %v536_v4 = vld [vmem:[%s3493_s4 + $0x150] sm:$0xff]  ;;  %v537_v6 = vld [vmem:[%s3493_s4 + $0x158] sm:$0xff]  ;;  %v554_v9 = vld [vmem:[%s3493_s4 + $0x1e0] sm:$0xff]  ;;  %v1972_v11 = vpack.c.bf16 %v505_v3, %v504_v2  ;;  %v1974_v15 = vpack.c.bf16 %v523_v8, %v522_v7 }
  0x6e   : > { %1965 = vmatpush3.bf16.msra.mxu0 %v1964_v51  ;;  %v555_v10 = vld [vmem:[%s3493_s4 + $0x1e8] sm:$0xff]  ;;  %v506_v12 = vld [vmem:[%s3493_s4 + $0x60] sm:$0xff]  ;;  %v2004_v14 = vpack.c.bf16 %v537_v6, %v536_v4  ;;  %v424_v18 = vld [vmem:[%s2641_s12 + $0x18] sm:$0xff] }
  0x6f   : > { %1997 = vmatpush3.bf16.msra.mxu1 %v1996_v52  ;;  %1967 = vmatprep.subr.bf16.mxu0 %v1966_v53  ;;  %v507_v13 = vld [vmem:[%s3493_s4 + $0x68] sm:$0xff]  ;;  %v538_v16 = vld [vmem:[%s3493_s4 + $0x160] sm:$0xff]  ;;  %v2006_v19 = vpack.c.bf16 %v555_v10, %v554_v9  ;;  %v524_v21 = vld [vmem:[%s3493_s4 + $0xf0] sm:$0xff] }
  0x70   : > { %1999 = vmatprep.subr.bf16.mxu1 %v1998_v57  ;;  %v422_v17 = vld [vmem:[%s2641_s12 + $0x8] sm:$0xff]  ;;  %v525_v22 = vld [vmem:[%s3493_s4 + $0xf8] sm:$0xff]  ;;  %v556_v23 = vld [vmem:[%s3493_s4 + $0x1f0] sm:$0xff]  ;;  %759 = vmatprep.mubr.f32.mxu1 %v424_v18  ;;  %v1976_v25 = vpack.c.bf16 %v507_v13, %v506_v12 }
  0x71   : > { %v539_v20 = vld [vmem:[%s3493_s4 + $0x168] sm:$0xff]  ;;  %654 = vmatprep.mubr.f32.mxu0 %v422_v17  ;;  %v557_v24 = vld [vmem:[%s3493_s4 + $0x1f8] sm:$0xff]  ;;  %v1978_v27 = vpack.c.bf16 %v525_v22, %v524_v21  ;;  %v508_v28 = vld [vmem:[%s3493_s4 + $0x70] sm:$0xff] }
  0x72   : > { %1969 = vmatpush3.bf16.msra.mxu0 %v1968_v63  ;;  %v2008_v26 = vpack.c.bf16 %v539_v20, %v538_v16  ;;  %v509_v29 = vld [vmem:[%s3493_s4 + $0x78] sm:$0xff]  ;;  %v540_v30 = vld [vmem:[%s3493_s4 + $0x170] sm:$0xff]  ;;  %v2010_v31 = vpack.c.bf16 %v557_v24, %v556_v23  ;;  %v574_v33 = vld [vmem:[%s3493_s4 + $0x280] sm:$0xff] }
  0x73   : > { %2001 = vmatpush3.bf16.msra.mxu1 %v2000_v0  ;;  %1971 = vmatprep.subr.bf16.mxu0 %v1970_v1  ;;  %v541_v32 = vld [vmem:[%s3493_s4 + $0x178] sm:$0xff]  ;;  %v575_v34 = vld [vmem:[%s3493_s4 + $0x288] sm:$0xff]  ;;  %v1980_v35 = vpack.c.bf16 %v509_v29, %v508_v28  ;;  %v558_v38 = vld [vmem:[%s3493_s4 + $0x200] sm:$0xff] }
  0x74   : > { %2003 = vmatprep.subr.bf16.mxu1 %v2002_v5  ;;  %v2012_v36 = vpack.c.bf16 %v541_v32, %v540_v30  ;;  %v2014_v37 = vpack.c.bf16 %v575_v34, %v574_v33  ;;  %v559_v39 = vld [vmem:[%s3493_s4 + $0x208] sm:$0xff]  ;;  %v576_v40 = vld [vmem:[%s3493_s4 + $0x290] sm:$0xff]  ;;  %v577_v41 = vld [vmem:[%s3493_s4 + $0x298] sm:$0xff] }
  0x75   : > { %v421_v42 = vld [vmem:[%s2641_s12] sm:$0xff]  ;;  %v2016_v43 = vpack.c.bf16 %v559_v39, %v558_v38  ;;  %v423_v44 = vld [vmem:[%s2641_s12 + $0x10] sm:$0xff]  ;;  %v561_v46 = vld [vmem:[%s3493_s4 + $0x218] sm:$0xff]  ;;  %v2018_v48 = vpack.c.bf16 %v577_v41, %v576_v40 }
  0x76   : > { %1973 = vmatpush3.bf16.msra.mxu0 %v1972_v11  ;;  %v560_v45 = vld [vmem:[%s3493_s4 + $0x210] sm:$0xff]  ;;  %v428_v47 = vld [vmem:[%s2641_s12 + $0x38] sm:$0xff]  ;;  %v430_v49 = vld [vmem:[%s2641_s12 + $0x48] sm:$0xff] }
  0x77   : > { %2005 = vmatpush3.bf16.msra.mxu1 %v2004_v14  ;;  %1975 = vmatprep.subr.bf16.mxu0 %v1974_v15  ;;  %v578_v50 = vld [vmem:[%s3493_s4 + $0x2a0] sm:$0xff]  ;;  %v579_v51 = vld [vmem:[%s3493_s4 + $0x2a8] sm:$0xff]  ;;  %v427_v52 = vld [vmem:[%s2641_s12 + $0x30] sm:$0xff]  ;;  %v2020_v53 = vpack.c.bf16 %v561_v46, %v560_v45 }
  0x78   : > { %2007 = vmatprep.subr.bf16.mxu1 %v2006_v19  ;;  %v429_v54 = vld [vmem:[%s2641_s12 + $0x40] sm:$0xff]  ;;  %v563_v56 = vld [vmem:[%s3493_s4 + $0x228] sm:$0xff]  ;;  %v2022_v58 = vpack.c.bf16 %v579_v51, %v578_v50  ;;  %v436_v59 = vld [vmem:[%s2641_s12 + $0x78] sm:$0xff] }
  0x79   : > { %v562_v55 = vld [vmem:[%s3493_s4 + $0x220] sm:$0xff]  ;;  %v434_v57 = vld [vmem:[%s2641_s12 + $0x68] sm:$0xff]  ;;  %v580_v60 = vld [vmem:[%s3493_s4 + $0x2b0] sm:$0xff] }
  0x7a   : > { %1977 = vmatpush3.bf16.msra.mxu0 %v1976_v25  ;;  %v581_v61 = vld [vmem:[%s3493_s4 + $0x2b8] sm:$0xff]  ;;  %v433_v62 = vld [vmem:[%s2641_s12 + $0x60] sm:$0xff]  ;;  %v2024_v63 = vpack.c.bf16 %v563_v56, %v562_v55  ;;  %v435_v0 = vld [vmem:[%s2641_s12 + $0x70] sm:$0xff] }
  0x7b   : > { %2009 = vmatpush3.bf16.msra.mxu1 %v2008_v26  ;;  %1979 = vmatprep.subr.bf16.mxu0 %v1978_v27  ;;  %v564_v1 = vld [vmem:[%s3493_s4 + $0x230] sm:$0xff]  ;;  %v565_v2 = vld [vmem:[%s3493_s4 + $0x238] sm:$0xff]  ;;  %v2026_v4 = vpack.c.bf16 %v581_v61, %v580_v60  ;;  %v442_v5 = vld [vmem:[%s2641_s12 + $0xa8] sm:$0xff] }
  0x7c   : > { %2011 = vmatprep.subr.bf16.mxu1 %v2010_v31  ;;  %v440_v3 = vld [vmem:[%s2641_s12 + $0x98] sm:$0xff]  ;;  %v582_v6 = vld [vmem:[%s3493_s4 + $0x2c0] sm:$0xff]  ;;  %v583_v7 = vld [vmem:[%s3493_s4 + $0x2c8] sm:$0xff]  ;;  %v2028_v9 = vpack.c.bf16 %v565_v2, %v564_v1  ;;  %v2448_v1 = vmov 0  }
  0x7d   : > { %v439_v8 = vld [vmem:[%s2641_s12 + $0x90] sm:$0xff]  ;;  %v441_v10 = vld [vmem:[%s2641_s12 + $0xa0] sm:$0xff]  ;;  %v567_v12 = vld [vmem:[%s3493_s4 + $0x248] sm:$0xff]  ;;  %v2030_v14 = vpack.c.bf16 %v583_v7, %v582_v6  ;;  %2176 = vset.pattern.permute.xlu0 %v2448_v1  ;;  %2177 = vset.pattern.permute.xlu1 %v2448_v1 }
  0x7e   : > { %1981 = vmatpush3.bf16.msra.mxu0 %v1980_v35  ;;  %v566_v11 = vld [vmem:[%s3493_s4 + $0x240] sm:$0xff]  ;;  %v446_v13 = vld [vmem:[%s2641_s12 + $0xc8] sm:$0xff]  ;;  %v448_v15 = vld [vmem:[%s2641_s12 + $0xd8] sm:$0xff] }
  0x7f   : > { %2013 = vmatpush3.bf16.msra.mxu1 %v2012_v36  ;;  %2015 = vmatprep.subr.bf16.mxu0 %v2014_v37  ;;  %v584_v16 = vld [vmem:[%s3493_s4 + $0x2d0] sm:$0xff]  ;;  %v585_v17 = vld [vmem:[%s3493_s4 + $0x2d8] sm:$0xff]  ;;  %v445_v18 = vld [vmem:[%s2641_s12 + $0xc0] sm:$0xff]  ;;  %v2032_v19 = vpack.c.bf16 %v567_v12, %v566_v11 }
  0x80   : > { %2046 = vmatprep.subr.bf16.mxu1 %v2014_v37  ;;  %v447_v20 = vld [vmem:[%s2641_s12 + $0xd0] sm:$0xff]  ;;  %v569_v22 = vld [vmem:[%s3493_s4 + $0x258] sm:$0xff]  ;;  %v2034_v24 = vpack.c.bf16 %v585_v17, %v584_v16  ;;  %v454_v25 = vld [vmem:[%s2641_s12 + $0x108] sm:$0xff] }
  0x81   : > { %655 = vmatmul.mubr.f32.vlgmr.msra.gmra.mrb[0].mxu0 %v421_v42  ;;  %v568_v21 = vld [vmem:[%s3493_s4 + $0x250] sm:$0xff]  ;;  %v452_v23 = vld [vmem:[%s2641_s12 + $0xf8] sm:$0xff]  ;;  %v586_v26 = vld [vmem:[%s3493_s4 + $0x2e0] sm:$0xff] }
  0x82   : > { %760 = vmatmul.mubr.f32.vlgmr.msra.gmra.mrb[0].mxu1 %v423_v44  ;;  %2017 = vmatpush3.bf16.msra.mxu0 %v2016_v43  ;;  %v587_v27 = vld [vmem:[%s3493_s4 + $0x2e8] sm:$0xff]  ;;  %v451_v28 = vld [vmem:[%s2641_s12 + $0xf0] sm:$0xff]  ;;  %v2036_v29 = vpack.c.bf16 %v569_v22, %v568_v21  ;;  %v453_v30 = vld [vmem:[%s2641_s12 + $0x100] sm:$0xff] }
  0x83   : > { %2054 = vmatpush3.bf16.msra.mxu1 %v2016_v43  ;;  %659 = vmatprep.mubr.f32.mxu0 %v428_v47  ;;  %v570_v31 = vld [vmem:[%s3493_s4 + $0x260] sm:$0xff]  ;;  %v571_v32 = vld [vmem:[%s3493_s4 + $0x268] sm:$0xff]  ;;  %v2038_v34 = vpack.c.bf16 %v587_v27, %v586_v26  ;;  %v460_v35 = vld [vmem:[%s2641_s12 + $0x138] sm:$0xff] }
  0x84   : > { %764 = vmatprep.mubr.f32.mxu1 %v430_v49  ;;  %2019 = vmatprep.subr.bf16.mxu0 %v2018_v48  ;;  %v458_v33 = vld [vmem:[%s2641_s12 + $0x128] sm:$0xff]  ;;  %v588_v36 = vld [vmem:[%s3493_s4 + $0x2f0] sm:$0xff]  ;;  %v589_v37 = vld [vmem:[%s3493_s4 + $0x2f8] sm:$0xff]  ;;  %v2040_v39 = vpack.c.bf16 %v571_v32, %v570_v31 }
  0x85   : > { %660 = vmatmul.mubr.f32.gmra.mrb[2].mxu0 %v427_v52  ;;  %2047 = vmatprep.subr.bf16.mxu1 %v2018_v48  ;;  %v457_v38 = vld [vmem:[%s2641_s12 + $0x120] sm:$0xff]  ;;  %v459_v40 = vld [vmem:[%s2641_s12 + $0x130] sm:$0xff]  ;;  %v573_v42 = vld [vmem:[%s3493_s4 + $0x278] sm:$0xff]  ;;  %v2042_v44 = vpack.c.bf16 %v589_v37, %v588_v36 }
  0x86   : > { %765 = vmatmul.mubr.f32.gmra.mrb[2].mxu1 %v429_v54  ;;  %2021 = vmatpush3.bf16.msra.mxu0 %v2020_v53  ;;  %v572_v41 = vld [vmem:[%s3493_s4 + $0x270] sm:$0xff]  ;;  %v464_v43 = vld [vmem:[%s2641_s12 + $0x158] sm:$0xff]  ;;  %v466_v45 = vld [vmem:[%s2641_s12 + $0x168] sm:$0xff] }
  0x87   : > { %2055 = vmatpush3.bf16.msra.mxu1 %v2020_v53  ;;  %664 = vmatprep.mubr.f32.mxu0 %v434_v57  ;;  %v463_v46 = vld [vmem:[%s2641_s12 + $0x150] sm:$0xff]  ;;  %v2044_v47 = vpack.c.bf16 %v573_v42, %v572_v41  ;;  %v465_v48 = vld [vmem:[%s2641_s12 + $0x160] sm:$0xff]  ;;  %v426_v49 = vld [vmem:[%s2641_s12 + $0x28] sm:$0xff] }
  0x88   : > { %769 = vmatprep.mubr.f32.mxu1 %v436_v59  ;;  %2023 = vmatprep.subr.bf16.mxu0 %v2022_v58  ;;  %v450_v50 = vld [vmem:[%s2641_s12 + $0xe8] sm:$0xff]  ;;  %v425_v51 = vld [vmem:[%s2641_s12 + $0x20] sm:$0xff]  ;;  %v432_v53 = vld [vmem:[%s2641_s12 + $0x58] sm:$0xff] }
  0x89   : > { %665 = vmatmul.mubr.f32.gmra.mrb[4].mxu0 %v433_v62  ;;  %2048 = vmatprep.subr.bf16.mxu1 %v2022_v58  ;;  %v449_v52 = vld [vmem:[%s2641_s12 + $0xe0] sm:$0xff]  ;;  %v456_v54 = vld [vmem:[%s2641_s12 + $0x118] sm:$0xff]  ;;  %v431_v55 = vld [vmem:[%s2641_s12 + $0x50] sm:$0xff] }
  0x8a   : > { %770 = vmatmul.mubr.f32.gmra.mrb[4].mxu1 %v435_v0  ;;  %2025 = vmatpush3.bf16.msra.mxu0 %v2024_v63  ;;  %v455_v56 = vld [vmem:[%s2641_s12 + $0x110] sm:$0xff]  ;;  %v438_v57 = vld [vmem:[%s2641_s12 + $0x88] sm:$0xff]  ;;  %v437_v59 = vld [vmem:[%s2641_s12 + $0x80] sm:$0xff] }
  0x8b   : > { %2056 = vmatpush3.bf16.msra.mxu1 %v2024_v63  ;;  %669 = vmatprep.mubr.f32.mxu0 %v440_v3  ;;  %v462_v58 = vld [vmem:[%s2641_s12 + $0x148] sm:$0xff]  ;;  %v461_v60 = vld [vmem:[%s2641_s12 + $0x140] sm:$0xff]  ;;  %v444_v61 = vld [vmem:[%s2641_s12 + $0xb8] sm:$0xff] }
  0x8c   : > { %774 = vmatprep.mubr.f32.mxu1 %v442_v5  ;;  %2027 = vmatprep.subr.bf16.mxu0 %v2026_v4  ;;  %v468_v62 = vld [vmem:[%s2641_s12 + $0x178] sm:$0xff]  ;;  %v443_v63 = vld [vmem:[%s2641_s12 + $0xb0] sm:$0xff] }
  0x8d   : > { %670 = vmatmul.mubr.f32.gmra.mrb[6].mxu0 %v439_v8  ;;  %2049 = vmatprep.subr.bf16.mxu1 %v2026_v4  ;;  %v467_v0 = vld [vmem:[%s2641_s12 + $0x170] sm:$0xff]  ;;  %s493_s12 = sld [smem:[#allocation4]] }
  0x8e   : > { %775 = vmatmul.mubr.f32.gmra.mrb[6].mxu1 %v441_v10  ;;  %2029 = vmatpush3.bf16.msra.mxu0 %v2028_v9 }
  0x8f   : > { %2057 = vmatpush3.bf16.msra.mxu1 %v2028_v9  ;;  %674 = vmatprep.mubr.f32.mxu0 %v446_v13 }
  0x90   : > { %779 = vmatprep.mubr.f32.mxu1 %v448_v15  ;;  %2031 = vmatprep.subr.bf16.mxu0 %v2030_v14 }
  0x91   : > { %675 = vmatmul.mubr.f32.gmra.mrb[8].mxu0 %v445_v18  ;;  %2050 = vmatprep.subr.bf16.mxu1 %v2030_v14 }
  0x92   : > { %780 = vmatmul.mubr.f32.gmra.mrb[8].mxu1 %v447_v20  ;;  %2033 = vmatpush3.bf16.msra.mxu0 %v2032_v19 }
  0x93   : > { %2058 = vmatpush3.bf16.msra.mxu1 %v2032_v19  ;;  %679 = vmatprep.mubr.f32.mxu0 %v452_v23 }
  0x94   : > { %784 = vmatprep.mubr.f32.mxu1 %v454_v25  ;;  %2035 = vmatprep.subr.bf16.mxu0 %v2034_v24 }
  0x95   : > { %680 = vmatmul.mubr.f32.gmra.mrb[10].mxu0 %v451_v28  ;;  %2051 = vmatprep.subr.bf16.mxu1 %v2034_v24 }
  0x96   : > { %785 = vmatmul.mubr.f32.gmra.mrb[10].mxu1 %v453_v30  ;;  %2037 = vmatpush3.bf16.msra.mxu0 %v2036_v29 }
  0x97   : > { %2059 = vmatpush3.bf16.msra.mxu1 %v2036_v29  ;;  %684 = vmatprep.mubr.f32.mxu0 %v458_v33 }
  0x98   : > { %789 = vmatprep.mubr.f32.mxu1 %v460_v35  ;;  %2039 = vmatprep.subr.bf16.mxu0 %v2038_v34 }
  0x99   : > { %685 = vmatmul.mubr.f32.gmra.mrb[12].mxu0 %v457_v38  ;;  %2052 = vmatprep.subr.bf16.mxu1 %v2038_v34 }
  0x9a   : > { %790 = vmatmul.mubr.f32.gmra.mrb[12].mxu1 %v459_v40  ;;  %2041 = vmatpush3.bf16.msra.mxu0 %v2040_v39 }
  0x9b   : > { %2060 = vmatpush3.bf16.msra.mxu1 %v2040_v39  ;;  %689 = vmatprep.mubr.f32.mxu0 %v464_v43 }
  0x9c   : > { %794 = vmatprep.mubr.f32.mxu1 %v466_v45  ;;  %2043 = vmatprep.subr.bf16.mxu0 %v2042_v44 }
  0x9d   : > { %690 = vmatmul.mubr.f32.gmra.mrb[14].mxu0 %v463_v46  ;;  %2053 = vmatprep.subr.bf16.mxu1 %v2042_v44 }
  0x9e   : > { %795 = vmatmul.mubr.f32.gmra.mrb[14].mxu1 %v465_v48  ;;  %2045 = vmatpush3.bf16.msra.mxu0 %v2044_v47 }
  0x9f   : > { %2061 = vmatpush3.bf16.msra.mxu1 %v2044_v47  ;;  %864 = vmatprep.mubr.f32.mxu0 %v426_v49 }
  0xa0   : > { %884 = vmatprep.mubr.f32.mxu1 %v450_v50 }
  0xa1   : > { %865 = vmatmul.mubr.f32.vlgmr.msra.gmra.mrb[16].mxu0 %v425_v51 }
  0xa2   : > { %885 = vmatmul.mubr.f32.vlgmr.msra.gmra.mrb[16].mxu1 %v449_v52  ;;  %869 = vmatprep.mubr.f32.mxu0 %v432_v53 }
  0xa3   : > { %889 = vmatprep.mubr.f32.mxu1 %v456_v54 }
  0xa5   : > { %870 = vmatmul.mubr.f32.gmra.mrb[18].mxu0 %v431_v55 }
  0xa6   : > { %890 = vmatmul.mubr.f32.gmra.mrb[18].mxu1 %v455_v56  ;;  %874 = vmatprep.mubr.f32.mxu0 %v438_v57 }
  0xa7   : > { %894 = vmatprep.mubr.f32.mxu1 %v462_v58 }
  0xa9   : > { %875 = vmatmul.mubr.f32.gmra.mrb[20].mxu0 %v437_v59 }
  0xaa   : > { %895 = vmatmul.mubr.f32.gmra.mrb[20].mxu1 %v461_v60  ;;  %879 = vmatprep.mubr.f32.mxu0 %v444_v61 }
  0xab   : > { %899 = vmatprep.mubr.f32.mxu1 %v468_v62 }
  0xad   : > { %880 = vmatmul.mubr.f32.gmra.mrb[22].mxu0 %v443_v63  ;;  %v905_v63 = vstv %s493_s12 }
  0xae   : > { %900 = vmatmul.mubr.f32.gmra.mrb[22].mxu1 %v467_v0 }
 0x154   : > { %v1814_v2 = vpop.f32.mrb[0].mxu0 }
 0x155   : > { %v1870_v3 = vpop.f32.mrb[0].mxu1  ;;  %v1815_v4 = vpop.f32.mrb[1].mxu0 }
 0x156   : > { %v1816_v5 = vadd.f32 %v1815_v4, %v1814_v2  ;;  %v1871_v6 = vpop.f32.mrb[1].mxu1 }
 0x157   : > { %v1872_v7 = vadd.f32 %v1871_v6, %v1870_v3 }
 0x158   : > { %v1817_v8 = vpop.f32.mrb[2].mxu0 }
 0x159   : > { %v762_v9 = vadd.f32 %v1872_v7, %v1816_v5  ;;  %v1873_v10 = vpop.f32.mrb[2].mxu1  ;;  %v1818_v11 = vpop.f32.mrb[3].mxu0 }
 0x15a   : > { %v1819_v12 = vadd.f32 %v1818_v11, %v1817_v8  ;;  %v1874_v13 = vpop.f32.mrb[3].mxu1 }
 0x15b   : > { %v1875_v14 = vadd.f32 %v1874_v13, %v1873_v10 }
 0x15c   : > { %v1820_v15 = vpop.f32.mrb[4].mxu0 }
 0x15d   : > { %v767_v16 = vadd.f32 %v1875_v14, %v1819_v12  ;;  %v1876_v17 = vpop.f32.mrb[4].mxu1  ;;  %v1821_v18 = vpop.f32.mrb[5].mxu0 }
 0x15e   : > { %v1822_v19 = vadd.f32 %v1821_v18, %v1820_v15  ;;  %v1877_v20 = vpop.f32.mrb[5].mxu1 }
 0x15f   : > { %v1878_v21 = vadd.f32 %v1877_v20, %v1876_v17 }
 0x160   : > { %v1823_v22 = vpop.f32.mrb[6].mxu0 }
 0x161   : > { %v3025_v23 = vadd.f32 %v1878_v21, %v1822_v19  ;;  %v1879_v24 = vpop.f32.mrb[6].mxu1  ;;  %v1824_v25 = vpop.f32.mrb[7].mxu0 }
 0x162   : > { %v1825_v26 = vadd.f32 %v1824_v25, %v1823_v22  ;;  %v1880_v27 = vpop.f32.mrb[7].mxu1 }
 0x163   : > { %v1881_v28 = vadd.f32 %v1880_v27, %v1879_v24 }
 0x164   : > { %v1826_v29 = vpop.f32.mrb[8].mxu0 }
 0x165   : > { %v3027_v30 = vadd.f32 %v1881_v28, %v1825_v26  ;;  %v1882_v31 = vpop.f32.mrb[8].mxu1  ;;  %v1827_v32 = vpop.f32.mrb[9].mxu0 }
 0x166   : > { %v1828_v33 = vadd.f32 %v1827_v32, %v1826_v29  ;;  %v1883_v34 = vpop.f32.mrb[9].mxu1 }
 0x167   : > { %v1884_v35 = vadd.f32 %v1883_v34, %v1882_v31 }
 0x168   : > { %v1829_v36 = vpop.f32.mrb[10].mxu0 }
 0x169   : > { %v782_v37 = vadd.f32 %v1884_v35, %v1828_v33  ;;  %v1885_v38 = vpop.f32.mrb[10].mxu1  ;;  %v1830_v39 = vpop.f32.mrb[11].mxu0 }
 0x16a   : > { %v1831_v40 = vadd.f32 %v1830_v39, %v1829_v36  ;;  %v1886_v41 = vpop.f32.mrb[11].mxu1 }
 0x16b   : > { %v1887_v42 = vadd.f32 %v1886_v41, %v1885_v38 }
 0x16c   : > { %v1832_v43 = vpop.f32.mrb[12].mxu0 }
 0x16d   : > { %v787_v44 = vadd.f32 %v1887_v42, %v1831_v40  ;;  %v1888_v45 = vpop.f32.mrb[12].mxu1  ;;  %v1833_v46 = vpop.f32.mrb[13].mxu0 }
 0x16e   : > { %v1834_v47 = vadd.f32 %v1833_v46, %v1832_v43  ;;  %v1889_v48 = vpop.f32.mrb[13].mxu1 }
 0x16f   : > { %v1890_v49 = vadd.f32 %v1889_v48, %v1888_v45 }
 0x170   : > { %v1835_v50 = vpop.f32.mrb[14].mxu0 }
 0x171   : > { %v792_v51 = vadd.f32 %v1890_v49, %v1834_v47  ;;  %v1891_v52 = vpop.f32.mrb[14].mxu1  ;;  %v1836_v53 = vpop.f32.mrb[15].mxu0 }
 0x172   : > { %v1837_v54 = vadd.f32 %v1836_v53, %v1835_v50  ;;  %v1892_v55 = vpop.f32.mrb[15].mxu1 }
 0x173   : > { %v1893_v56 = vadd.f32 %v1892_v55, %v1891_v52 }
 0x174   : > { %v1926_v57 = vpop.f32.mrb[16].mxu0 }
 0x175   : > { %v797_v58 = vadd.f32 %v1893_v56, %v1837_v54  ;;  %v1938_v59 = vpop.f32.mrb[16].mxu1  ;;  %v1927_v60 = vpop.f32.mrb[17].mxu0 }
 0x176   : > { %v1928_v61 = vadd.f32 %v1927_v60, %v1926_v57  ;;  %v1939_v62 = vpop.f32.mrb[17].mxu1 }
 0x177   : > { %v1940_v0 = vadd.f32 %v1939_v62, %v1938_v59 }
 0x178   : > { %v867_v1 = vadd.f32 %v1928_v61, %v762_v9  ;;  %v1929_v2 = vpop.f32.mrb[18].mxu0 }
 0x179   : > { %v887_v3 = vadd.f32 %v1940_v0, %v782_v37  ;;  %v1941_v4 = vpop.f32.mrb[18].mxu1  ;;  %v1930_v5 = vpop.f32.mrb[19].mxu0 }
 0x17a   : > { %v3029_v6 = vadd.f32 %v905_v63, %v867_v1  ;;  %v1931_v7 = vadd.f32 %v1930_v5, %v1929_v2  ;;  %v1942_v8 = vpop.f32.mrb[19].mxu1 }
 0x17b   : > { %v3031_v10 = vadd.f32 %v905_v63, %v887_v3  ;;  %v1943_v11 = vadd.f32 %v1942_v8, %v1941_v4 }
 0x17c   : > { %v922_v12 = vand.u32 2147483647, %v3029_v6  ;;  %v872_v13 = vadd.f32 %v1931_v7, %v767_v16  ;;  %v1932_v14 = vpop.f32.mrb[20].mxu0 }
 0x17d   : > { %v926_v15 = vand.u32 2147483647, %v3031_v10  ;;  %v892_v17 = vadd.f32 %v1943_v11, %v787_v44  ;;  %v1944_v18 = vpop.f32.mrb[20].mxu1  ;;  %v1933_v9 = vpop.f32.mrb[21].mxu0 }
 0x17e   : > { %v930_v19 = vsub.f32 0.0, %v922_v12  ;;  %v3035_v20 = vadd.f32 %v905_v63, %v872_v13  ;;  %v1934_v21 = vadd.f32 %v1933_v9, %v1932_v14  ;;  %v1945_v22 = vpop.f32.mrb[21].mxu1  ;;  %v914_v14 = vmax.f32 %v3029_v6, 0.0 }
 0x17f   : > { %v934_v24 = vsub.f32 0.0, %v926_v15  ;;  %v3037_v25 = vadd.f32 %v905_v63, %v892_v17  ;;  %v1946_v26 = vadd.f32 %v1945_v22, %v1944_v18  ;;  %v918_v9 = vmax.f32 %v3031_v10, 0.0 }
 0x180   : > { %v938_v27 = vmul.f32 1.442695, %v930_v19  ;;  %v923_v28 = vand.u32 2147483647, %v3035_v20  ;;  %v877_v16 = vadd.f32 %v1934_v21, %v3025_v23  ;;  %v1935_v29 = vpop.f32.mrb[22].mxu0 }
 0x181   : > { %v946_v31 = vmul.f32 1.442695, %v934_v24  ;;  %v927_v32 = vand.u32 2147483647, %v3037_v25  ;;  %v897_v33 = vadd.f32 %v1946_v26, %v792_v51  ;;  %v1947_v34 = vpop.f32.mrb[22].mxu1  ;;  %v1936_v35 = vpop.f32.mrb[23].mxu0 }
 0x182   : > { %2178 = vpow2.f32 %v938_v27  ;;  %v931_v36 = vsub.f32 0.0, %v923_v28  ;;  %v3042_v37 = vadd.f32 %v905_v63, %v877_v16  ;;  %v1937_v38 = vadd.f32 %v1936_v35, %v1935_v29  ;;  %v1948_v39 = vpop.f32.mrb[23].mxu1 }
 0x183   : > { %2180 = vpow2.f32 %v946_v31  ;;  %v935_v40 = vsub.f32 0.0, %v927_v32  ;;  %v3044_v41 = vadd.f32 %v905_v63, %v897_v33  ;;  %v1949_v42 = vadd.f32 %v1948_v39, %v1947_v34 }
 0x184   : > { %v940_v43 = vmul.f32 1.442695, %v931_v36  ;;  %v924_v23 = vand.u32 2147483647, %v3042_v37  ;;  %v882_v44 = vadd.f32 %v1937_v38, %v3027_v30  ;;  %v919_v18 = vmax.f32 %v3037_v25, 0.0 }
 0x185   : > { %v948_v45 = vmul.f32 1.442695, %v935_v40  ;;  %v928_v46 = vand.u32 2147483647, %v3044_v41  ;;  %v902_v47 = vadd.f32 %v1949_v42, %v797_v58  ;;  %v916_v24 = vmax.f32 %v3042_v37, 0.0 }
 0x186   : > { %2182 = vpow2.f32 %v940_v43  ;;  %v932_v48 = vsub.f32 0.0, %v924_v23  ;;  %v3049_v49 = vadd.f32 %v905_v63, %v882_v44  ;;  %v478_v44 = vld [vmem:[%s2661_s15 + $0x8] sm:$0xff] }
 0x187   : > { %2184 = vpow2.f32 %v948_v45  ;;  %v936_v50 = vsub.f32 0.0, %v928_v46  ;;  %v3051_v51 = vadd.f32 %v905_v63, %v902_v47 }
 0x188   : > { %v942_v52 = vmul.f32 1.442695, %v932_v48  ;;  %v925_v53 = vand.u32 2147483647, %v3049_v49 }
 0x189   : > { %v950_v54 = vmul.f32 1.442695, %v936_v50  ;;  %v929_v55 = vand.u32 2147483647, %v3051_v51  ;;  %v921_v16 = vmax.f32 %v3051_v51, 0.0 }
 0x18a   : > { %2186 = vpow2.f32 %v942_v52  ;;  %v933_v30 = vsub.f32 0.0, %v925_v53 }
 0x18b   : > { %2188 = vpow2.f32 %v950_v54  ;;  %v937_v56 = vsub.f32 0.0, %v929_v55 }
 0x18c   : > { %v2179_v57 = vpop.eup %2178  ;;  %v944_v58 = vmul.f32 1.442695, %v933_v30 }
 0x18d   : > { %v2181_v59 = vpop.eup %2180  ;;  %v952_v60 = vmul.f32 1.442695, %v937_v56  ;;  %v954_v61 = vadd.f32 1.0, %v2179_v57  ;;  %v957_v2 = vmul.f32 -0.5, %v2179_v57  ;;  %v960_v12 = vand.u32 2147483647, %v2179_v57 }
 0x18e   : > { %2190 = vpow2.f32 %v944_v58  ;;  %v990_v62 = vadd.f32 1.0, %v2181_v59  ;;  %v993_v7 = vmul.f32 -0.5, %v2181_v59  ;;  %v996_v25 = vand.u32 2147483647, %v2181_v59 }
 0x18f   : > { %2192 = vpow2.f32 %v952_v60  ;;  %v958_v11 = vadd.f32 1.0, %v957_v2  ;;  %vm3071_vm1 = vcmp.lt.f32.partialorder %v960_v12, 0.0004427343 }
 0x190   : > { %v2183_v63 = vpop.eup %2182  ;;  %2194 = vlog2.f32 %v954_v61  ;;  %v994_v22 = vadd.f32 1.0, %v993_v7  ;;  %vm3079_vm2 = vcmp.lt.f32.partialorder %v996_v25, 0.0004427343  ;;  %v486_v25 = vld [vmem:[%s2666_s9 + $0x8] sm:$0xff] }
 0x191   : > { %v2185_v0 = vpop.eup %2184  ;;  %2196 = vlog2.f32 %v990_v62  ;;  %v963_v1 = vadd.f32 1.0, %v2183_v63  ;;  %v966_v19 = vmul.f32 -0.5, %v2183_v63  ;;  %v959_v28 = vmul.f32 %v2179_v57, %v958_v11 }
 0x192   : > { %v999_v3 = vadd.f32 1.0, %v2185_v0  ;;  %v1002_v15 = vmul.f32 -0.5, %v2185_v0  ;;  %v1005_v33 = vand.u32 2147483647, %v2185_v0  ;;  %v969_v36 = vand.u32 2147483647, %v2183_v63 }
 0x193   : > { %2198 = vlog2.f32 %v963_v1  ;;  %v967_v35 = vadd.f32 1.0, %v966_v19  ;;  %v995_v39 = vmul.f32 %v2181_v59, %v994_v22 }
 0x194   : > { %v3055_v4 = vpop.eup %2186  ;;  %2200 = vlog2.f32 %v999_v3  ;;  %v1003_v32 = vadd.f32 1.0, %v1002_v15  ;;  %vm1006_vm3 = vcmp.lt.f32.partialorder %v1005_v33, 0.0004427343  ;;  %vm3087_vm4 = vcmp.lt.f32.partialorder %v969_v36, 0.0004427343  ;;  %v477_v33 = vld [vmem:[%s2661_s15] sm:$0xff] }
 0x195   : > { %v3057_v5 = vpop.eup %2188  ;;  %v972_v8 = vadd.f32 1.0, %v3055_v4  ;;  %v975_v26 = vmul.f32 -0.5, %v3055_v4  ;;  %v978_v45 = vand.u32 2147483647, %v3055_v4  ;;  %v968_v53 = vmul.f32 %v2183_v63, %v967_v35  ;;  %v481_v36 = vld [vmem:[%s2661_s15 + $0x20] sm:$0xff] }
 0x196   : > { %v1008_v13 = vadd.f32 1.0, %v3057_v5  ;;  %v1011_v42 = vmul.f32 -0.5, %v3057_v5  ;;  %v1004_v48 = vmul.f32 %v2185_v0, %v1003_v32  ;;  %v1014_v55 = vand.u32 2147483647, %v3057_v5  ;;  %v490_v32 = vld [vmem:[%s2666_s9 + $0x28] sm:$0xff] }
 0x197   : > { %2202 = vlog2.f32 %v972_v8  ;;  %v976_v40 = vadd.f32 1.0, %v975_v26  ;;  %vm979_vm5 = vcmp.lt.f32.partialorder %v978_v45, 0.0004427343  ;;  %v917_v26 = vmax.f32 %v3049_v49, 0.0 }
 0x198   : > { %v3062_v17 = vpop.eup %2190  ;;  %2204 = vlog2.f32 %v1008_v13  ;;  %v1012_v58 = vadd.f32 1.0, %v1011_v42  ;;  %vm3099_vm6 = vcmp.lt.f32.partialorder %v1014_v55, 0.0004427343 }
 0x199   : > { %v3066_v21 = vpop.eup %2192  ;;  %v981_v27 = vadd.f32 1.0, %v3062_v17  ;;  %v984_v46 = vmul.f32 -0.5, %v3062_v17  ;;  %v977_v57 = vmul.f32 %v3055_v4, %v976_v40  ;;  %v987_v2 = vand.u32 2147483647, %v3062_v17  ;;  %v473_v40 = vld [vmem:[%s2656_s7 + $0x20] sm:$0xff] }
 0x19a   : > { %v2195_v6 = vpop.eup %2194  ;;  %v1017_v10 = vadd.f32 1.0, %v3066_v21  ;;  %v1020_v59 = vmul.f32 -0.5, %v3066_v21  ;;  %v915_v4 = vmax.f32 %v3035_v20, 0.0  ;;  %v1013_v12 = vmul.f32 %v3057_v5, %v1012_v58  ;;  %v474_v58 = vld [vmem:[%s2656_s7 + $0x28] sm:$0xff] }
 0x19b   : > { %v2197_v29 = vpop.eup %2196  ;;  %v956_v31 = vmul.f32 0.6931472, %v2195_v6  ;;  %2206 = vlog2.f32 %v981_v27  ;;  %v985_v1 = vadd.f32 1.0, %v984_v46  ;;  %v1023_v22 = vand.u32 2147483647, %v3066_v21 }
 0x19c   : > { %v992_v34 = vmul.f32 0.6931472, %v2197_v29  ;;  %2208 = vlog2.f32 %v1017_v10  ;;  %vm988_vm7 = vcmp.lt.f32.partialorder %v987_v2, 0.0004427343  ;;  %v920_v27 = vmax.f32 %v3044_v41, 0.0  ;;  %v485_v41 = vld [vmem:[%s2666_s9] sm:$0xff] }
 0x19d   : > { %v2199_v37 = vpop.eup %2198  ;;  %v962_v38 = vsel %vm3071_vm1, %v959_v28, %v956_v31  ;;  %v986_v19 = vmul.f32 %v3062_v17, %v985_v1  ;;  %vm1024_vm8 = vcmp.lt.f32.partialorder %v1023_v22, 0.0004427343  ;;  %v489_v29 = vld [vmem:[%s2666_s9 + $0x20] sm:$0xff]  ;;  %v488_v31 = vld [vmem:[%s2666_s9 + $0x18] sm:$0xff] }
 0x19e   : > { %v2201_v43 = vpop.eup %2200  ;;  %v1026_v23 = vadd.f32 %v962_v38, %v914_v14  ;;  %v998_v50 = vsel %vm3079_vm2, %v995_v39, %v992_v34  ;;  %v965_v52 = vmul.f32 0.6931472, %v2199_v37  ;;  %v1021_v14 = vadd.f32 1.0, %v1020_v59  ;;  %v469_v34 = vld [vmem:[%s2656_s7] sm:$0xff] }
 0x19f   : > { %v1001_v47 = vmul.f32 0.6931472, %v2201_v43  ;;  %v1030_v62 = vadd.f32 %v998_v50, %v918_v9  ;;  %v470_v50 = vld [vmem:[%s2656_s7 + $0x8] sm:$0xff] }
 0x1a0   : > { %1036 = vperm.xlu0 %2176, %v1026_v23   ;;  %v971_v63 = vsel %vm3087_vm4, %v968_v53, %v965_v52  ;;  %v1022_v17 = vmul.f32 %v3066_v21, %v1021_v14  ;;  %v487_v21 = vld [vmem:[%s2666_s9 + $0x10] sm:$0xff]  ;;  %vm1490_vm4 = vcmask 7168  }
 0x1a1   : > { %v2203_v30 = vpop.eup %2202  ;;  %v1007_v56 = vsel %vm1006_vm3, %v1004_v48, %v1001_v47  ;;  %v482_v47 = vld [vmem:[%s2661_s15 + $0x28] sm:$0xff] }
 0x1a2   : > { %v2205_v60 = vpop.eup %2204  ;;  %v1031_v61 = vadd.f32 %v1007_v56, %v919_v18  ;;  %v974_v0 = vmul.f32 0.6931472, %v2203_v30  ;;  %v1027_v18 = vadd.f32 %v971_v63, %v915_v4  ;;  %v479_v56 = vld [vmem:[%s2661_s15 + $0x10] sm:$0xff] }
 0x1a3   : > { %v1010_v3 = vmul.f32 0.6931472, %v2205_v60  ;;  %v471_v63 = vld [vmem:[%s2656_s7 + $0x10] sm:$0xff] }
 0x1a4   : > { %1061 = vperm.xlu1 %2177, %v1031_v61   ;;  %1056 = vperm.xlu0 %2176, %v1030_v62   ;;  %v980_v7 = vsel %vm979_vm5, %v977_v57, %v974_v0  ;;  %v483_v0 = vld [vmem:[%s2661_s15 + $0x30] sm:$0xff] }
 0x1a5   : > { %v2207_v8 = vpop.eup %2206  ;;  %v1028_v11 = vadd.f32 %v980_v7, %v916_v24  ;;  %v1016_v20 = vsel %vm3099_vm6, %v1013_v12, %v1010_v3  ;;  %v475_v12 = vld [vmem:[%s2656_s7 + $0x30] sm:$0xff] }
 0x1a6   : > { %v2209_v15 = vpop.eup %2208  ;;  %v983_v9 = vmul.f32 0.6931472, %v2207_v8  ;;  %v1032_v28 = vadd.f32 %v1016_v20, %v920_v27 }
 0x1a7   : > { %v1019_v5 = vmul.f32 0.6931472, %v2209_v15 }
 0x1a8   : > { %1046 = vperm.xlu1 %2177, %v1028_v11   ;;  %1041 = vperm.xlu0 %2176, %v1027_v18   ;;  %v989_v24 = vsel %vm988_vm7, %v986_v19, %v983_v9  ;;  %v480_v11 = vld [vmem:[%s2661_s15 + $0x18] sm:$0xff] }
 0x1a9   : > { %v1029_v6 = vadd.f32 %v989_v24, %v917_v26  ;;  %v1025_v49 = vsel %vm1024_vm8, %v1022_v17, %v1019_v5  ;;  %v484_v9 = vld [vmem:[%s2661_s15 + $0x38] sm:$0xff] }
 0x1aa   : > { %v1033_v10 = vadd.f32 %v1025_v49, %v921_v16  ;;  %v472_v5 = vld [vmem:[%s2656_s7 + $0x18] sm:$0xff] }
 0x1ab   : > { %v492_v16 = vld [vmem:[%s2666_s9 + $0x38] sm:$0xff] }
 0x1ac   : > { %1051 = vperm.xlu1 %2177, %v1029_v6   ;;  %1066 = vperm.xlu0 %2176, %v1032_v28   ;;  %v476_v6 = vld [vmem:[%s2656_s7 + $0x38] sm:$0xff]  ;;  %s1769_s7 = sshll.u32 %s2650_s22, 6 }
 0x1b0   : > { %1071 = vperm.xlu1 %2177, %v1033_v10   ;;  %1337 = vperm.xlu0 %2176, %v486_v25   ;;  %v491_v25 = vld [vmem:[%s2666_s9 + $0x30] sm:$0xff]  ;;  %v1331_v10 = vlaneseq }
 0x1b4   : > { %1334 = vperm.xlu1 %2177, %v485_v41   ;;  %1346 = vperm.xlu0 %2176, %v489_v29   ;;  %v3208_v29 = vand.u32 127, %v1331_v10 }
 0x1b8   : > { %1340 = vperm.xlu1 %2177, %v487_v21  }
 0x1bc   : > { %1343 = vperm.xlu1 %2177, %v488_v31   ;;  %v2449_v31 = vmov 0.0  }
 0x1c0   : > { %1349 = vperm.xlu1 %2177, %v490_v32  }
 0x21f   : > { %v1037_v51 = vpop.permute.xlu0 %1036 }
 0x220   : > { %v3119_v35 = vmul.f32 %v1037_v51, %v477_v33 }
 0x222   : > { %v1083_v37 = vsel %vm1082_vm9, %v3119_v35, -inf  ;;  %v3125_v38 = vadd.f32 %v3119_v35, %v469_v34 }
 0x223   : > { %1084 = vmax.xlane.f32.xlu1 %v1083_v37  ;;  %v1057_v39 = vpop.permute.xlu0 %1056  ;;  %v1062_v23 = vpop.permute.xlu1 %1061 }
 0x224   : > { %v3128_v42 = vmul.f32 %v1057_v39, %v481_v36  ;;  %v1235_v43 = vsel %vm1082_vm9, %v3125_v38, -inf  ;;  %v3142_v53 = vmul.f32 %v1062_v23, %v482_v47 }
 0x225   : > { %1236 = vmax.xlane.f32.xlu0 %v1235_v43 }
 0x226   : > { %v1095_v45 = vsel %vm1082_vm9, %v3128_v42, -inf  ;;  %v3136_v46 = vadd.f32 %v3128_v42, %v473_v40  ;;  %v1098_v61 = vsel %vm1082_vm9, %v3142_v53, -inf  ;;  %v3160_v62 = vadd.f32 %v3142_v53, %v474_v58 }
 0x227   : > { %1096 = vmax.xlane.f32.xlu1 %v1095_v45  ;;  %v1042_v48 = vpop.permute.xlu0 %1041  ;;  %v1047_v57 = vpop.permute.xlu1 %1046 }
 0x228   : > { %v3140_v52 = vmul.f32 %v1042_v48, %v478_v44  ;;  %v1247_v54 = vsel %vm1082_vm9, %v3136_v46, -inf  ;;  %v3153_v59 = vmul.f32 %v1047_v57, %v479_v56  ;;  %v1250_v4 = vsel %vm1082_vm9, %v3160_v62, -inf }
 0x22a   : > { %v1086_v55 = vsel %vm1082_vm9, %v3140_v52, -inf  ;;  %v3149_v30 = vadd.f32 %v3140_v52, %v470_v50  ;;  %v1089_v7 = vsel %vm1082_vm9, %v3153_v59, -inf  ;;  %v3171_v8 = vadd.f32 %v3153_v59, %v471_v63 }
 0x22b   : > { %1248 = vmax.xlane.f32.xlu1 %v1247_v54  ;;  %1087 = vmax.xlane.f32.xlu0 %v1086_v55  ;;  %v1067_v1 = vpop.permute.xlu0 %1066  ;;  %v1052_v2 = vpop.permute.xlu1 %1051 }
 0x22c   : > { %v1238_v60 = vsel %vm1082_vm9, %v3149_v30, -inf  ;;  %v3164_v3 = vmul.f32 %v1067_v1, %v483_v0  ;;  %v3175_v13 = vmul.f32 %v1052_v2, %v480_v11  ;;  %v1241_v14 = vsel %vm1082_vm9, %v3171_v8, -inf }
 0x22e   : > { %v1101_v15 = vsel %vm1082_vm9, %v3164_v3, -inf  ;;  %v3182_v18 = vadd.f32 %v3164_v3, %v475_v12  ;;  %v1092_v26 = vsel %vm1082_vm9, %v3175_v13, -inf  ;;  %v3195_v27 = vadd.f32 %v3175_v13, %v472_v5 }
 0x22f   : > { %1239 = vmax.xlane.f32.xlu1 %v1238_v60  ;;  %1099 = vmax.xlane.f32.xlu0 %v1098_v61  ;;  %v1072_v19 = vpop.permute.xlu1 %1071  ;;  %v1338_v34 = vpop.permute.xlu0 %1337 }
 0x230   : > { %v3185_v22 = vmul.f32 %v1072_v19, %v484_v9  ;;  %v1253_v20 = vsel %vm1082_vm9, %v3182_v18, -inf  ;;  %v1244_v17 = vsel %vm1082_vm9, %v3195_v27, -inf  ;;  %vm1358_vm12 = vcmp.eq.s32.totalorder %v3208_v29, %v1338_v34 }
 0x231   : > { %v1761_v43 = vsel %vm1358_vm12, 1.0, %v2449_v31 }
 0x232   : > { %v1104_v24 = vsel %vm1082_vm9, %v3185_v22, -inf  ;;  %v3201_v28 = vadd.f32 %v3185_v22, %v476_v6  ;;  %v1382_v23 = vmul.f32 %v1761_v43, %v3149_v30 }
 0x233   : > { %1090 = vmax.xlane.f32.xlu1 %v1089_v7  ;;  %1251 = vmax.xlane.f32.xlu0 %v1250_v4  ;;  %v1335_v41 = vpop.permute.xlu1 %1334  ;;  %v3228_v54 = vpop.permute.xlu0 %1346 }
 0x234   : > { %v1256_v49 = vsel %vm1082_vm9, %v3201_v28, -inf  ;;  %vm1357_vm10 = vcmp.eq.s32.totalorder %v3208_v29, %v1335_v41  ;;  %v1392_v45 = vsel %vm1082_vm9, %v1382_v23, 0.0  ;;  %vm1361_vm14 = vcmp.eq.s32.totalorder %v3208_v29, %v3228_v54 }
 0x235   : > { %v1760_v32 = vsel %vm1357_vm10, 1.0, %v2449_v31 }
 0x236   : > { %v1381_v33 = vmul.f32 %v1760_v32, %v3125_v38 }
 0x237   : > { %1242 = vmax.xlane.f32.xlu0 %v1241_v14  ;;  %1102 = vmax.xlane.f32.xlu1 %v1101_v15  ;;  %v1341_v21 = vpop.permute.xlu1 %1340 }
 0x238   : > { %vm1359_vm11 = vcmp.eq.s32.totalorder %v3208_v29, %v1341_v21  ;;  %v1389_v36 = vsel %vm1082_vm9, %v1381_v33, 0.0 }
 0x239   : > { %v1762_v51 = vsel %vm1359_vm11, 1.0, %v2449_v31 }
 0x23a   : > { %v1383_v37 = vmul.f32 %v1762_v51, %v3171_v8 }
 0x23b   : > { %1093 = vmax.xlane.f32.xlu0 %v1092_v26  ;;  %1254 = vmax.xlane.f32.xlu1 %v1253_v20  ;;  %v1344_v39 = vpop.permute.xlu1 %1343 }
 0x23c   : > { %v1395_v40 = vsel %vm1082_vm9, %v1383_v37, 0.0  ;;  %vm1360_vm13 = vcmp.eq.s32.totalorder %v3208_v29, %v1344_v39 }
 0x23d   : > { %v1763_v44 = vsel %vm1360_vm13, 1.0, %v2449_v31 }
 0x23e   : > { %v1384_v47 = vmul.f32 %v1763_v44, %v3195_v27 }
 0x23f   : > { %1105 = vmax.xlane.f32.xlu0 %v1104_v24  ;;  %v3226_v50 = vpop.permute.xlu1 %1349 }
 0x240   : > { %v1398_v48 = vsel %vm1082_vm9, %v1384_v47, 0.0  ;;  %vm1362_vm0 = vcmp.eq.s32.totalorder %v3208_v29, %v3226_v50 }
 0x243   : > { %1245 = vmax.xlane.f32.xlu0 %v1244_v17 }
 0x247   : > { %1257 = vmax.xlane.f32.xlu0 %v1256_v49 }
 0x24c   : > { %1355 = vperm.xlu1 %2177, %v492_v16  }
 0x25d   : > { %1352 = vperm.xlu0 %2176, %v491_v25  }
 0x270   : > { %1390 = vadd.xlane.f32.xlu1 %v1389_v36 }
 0x274   : > { %1396 = vadd.xlane.f32.xlu1 %v1395_v40 }
 0x27c   : > { %1393 = vadd.xlane.f32.xlu0 %v1392_v45 }
 0x280   : > { %1399 = vadd.xlane.f32.xlu0 %v1398_v48 }
 0x2b0   : > { %v1085_v55 = vpop.xlane.xlu1 %1084 }
 0x2b1   : > { %v1107_v56 = vsub.f32 %v3119_v35, %v1085_v55 }
 0x2b2   : > { %v3231_v57 = vpop.xlane.xlu0 %1236 }
 0x2b3   : > { %v1115_v58 = vmul.f32 1.442695, %v1107_v56  ;;  %v1259_v60 = vsub.f32 %v3125_v38, %v3231_v57 }
 0x2b4   : > { %v1097_v61 = vpop.xlane.xlu1 %1096 }
 0x2b5   : > { %2210 = vpow2.f32 %v1115_v58  ;;  %v1267_v0 = vmul.f32 1.442695, %v1259_v60  ;;  %v1111_v1 = vsub.f32 %v3128_v42, %v1097_v61 }
 0x2b7   : > { %2212 = vpow2.f32 %v1267_v0  ;;  %v1123_v63 = vmul.f32 1.442695, %v1111_v1 }
 0x2b8   : > { %v3236_v2 = vpop.xlane.xlu1 %1248  ;;  %v1088_v7 = vpop.xlane.xlu0 %1087 }
 0x2b9   : > { %2214 = vpow2.f32 %v1123_v63  ;;  %v1263_v35 = vsub.f32 %v3136_v46, %v3236_v2  ;;  %v3241_v4 = vsub.f32 %v3140_v52, %v1088_v7 }
 0x2bb   : > { %v1275_v11 = vmul.f32 1.442695, %v1263_v35  ;;  %v1117_v38 = vmul.f32 1.442695, %v3241_v4 }
 0x2bc   : > { %v3244_v12 = vpop.xlane.xlu1 %1239  ;;  %v1100_v14 = vpop.xlane.xlu0 %1099 }
 0x2bd   : > { %2216 = vpow2.f32 %v1275_v11  ;;  %v3247_v42 = vsub.f32 %v3142_v53, %v1100_v14  ;;  %v1260_v9 = vsub.f32 %v3149_v30, %v3244_v12 }
 0x2be   : > { %2218 = vpow2.f32 %v1117_v38 }
 0x2bf   : > { %v2211_v15 = vpop.eup %2210  ;;  %v1125_v19 = vmul.f32 1.442695, %v3247_v42  ;;  %v1269_v17 = vmul.f32 1.442695, %v1260_v9 }
 0x2c0   : > { %v1091_v26 = vpop.xlane.xlu1 %1090  ;;  %v3252_v52 = vpop.xlane.xlu0 %1251  ;;  %v1131_v20 = vsel %vm1082_vm9, %v2211_v15, 0.0  ;;  %v1171_v39 = vmul.f32 %v2211_v15, %v1107_v56 }
 0x2c1   : > { %v2213_v5 = vpop.eup %2212  ;;  %v1264_v24 = vsub.f32 %v3160_v62, %v3252_v52  ;;  %1132 = vadd.xlane.f32.xlu1 %v1131_v20  ;;  %2220 = vpow2.f32 %v1125_v19  ;;  %v3259_v49 = vsub.f32 %v3153_v59, %v1091_v26 }
 0x2c2   : > { %v1283_v53 = vsel %vm1082_vm9, %v2213_v5, 0.0  ;;  %v1179_v47 = vsel %vm1082_vm9, %v1171_v39, 0.0 }
 0x2c3   : > { %v2215_v6 = vpop.eup %2214  ;;  %v1277_v30 = vmul.f32 1.442695, %v1264_v24  ;;  %1284 = vadd.xlane.f32.xlu0 %v1283_v53  ;;  %v1119_v32 = vmul.f32 1.442695, %v3259_v49 }
 0x2c4   : > { %v1103_v16 = vpop.xlane.xlu1 %1102  ;;  %v3261_v25 = vpop.xlane.xlu0 %1242  ;;  %v1143_v41 = vsel %vm1082_vm9, %v2215_v6, 0.0  ;;  %v1175_v48 = vmul.f32 %v2215_v6, %v1111_v1  ;;  %v1764_v6 = vsel %vm1361_vm14, 1.0, %v2449_v31 }
 0x2c5   : > { %1144 = vadd.xlane.f32.xlu1 %v1143_v41  ;;  %2222 = vpow2.f32 %v1277_v30  ;;  %v3266_v33 = vsub.f32 %v3164_v3, %v1103_v16  ;;  %v1261_v59 = vsub.f32 %v3171_v8, %v3261_v25  ;;  %v1385_v41 = vmul.f32 %v1764_v6, %v3136_v46 }
 0x2c6   : > { %2224 = vpow2.f32 %v1269_v17 }
 0x2c7   : > { %v2217_v21 = vpop.eup %2216  ;;  %2226 = vpow2.f32 %v1119_v32  ;;  %v1127_v43 = vmul.f32 1.442695, %v3266_v33  ;;  %v1271_v44 = vmul.f32 1.442695, %v1261_v59 }
 0x2c8   : > { %v2219_v51 = vpop.eup %2218  ;;  %v3270_v34 = vpop.xlane.xlu1 %1254  ;;  %v1295_v37 = vsel %vm1082_vm9, %v2217_v21, 0.0 }
 0x2c9   : > { %v1094_v36 = vpop.xlane.xlu0 %1093  ;;  %1296 = vadd.xlane.f32.xlu1 %v1295_v37  ;;  %v1134_v40 = vsel %vm1082_vm9, %v2219_v51, 0.0  ;;  %v1265_v3 = vsub.f32 %v3182_v18, %v3270_v34  ;;  %2228 = vpow2.f32 %v1127_v43  ;;  %v1172_v7 = vmul.f32 %v2219_v51, %v3241_v4 }
 0x2ca   : > { %1135 = vadd.xlane.f32.xlu0 %v1134_v40  ;;  %v3278_v8 = vsub.f32 %v3175_v13, %v1094_v36  ;;  %2230 = vpow2.f32 %v1271_v44  ;;  %v1191_v13 = vsel %vm1082_vm9, %v1175_v48, 0.0  ;;  %v1401_v51 = vsel %vm1082_vm9, %v1385_v41, 0.0 }
 0x2cb   : > { %v2221_v23 = vpop.eup %2220  ;;  %v1279_v56 = vmul.f32 1.442695, %v1265_v3  ;;  %v1182_v15 = vsel %vm1082_vm9, %v1172_v7, 0.0  ;;  %v1765_v3 = vsel %vm1362_vm0, 1.0, %v2449_v31 }
 0x2cc   : > { %v1146_v55 = vsel %vm1082_vm9, %v2221_v23, 0.0  ;;  %v1121_v60 = vmul.f32 1.442695, %v3278_v8  ;;  %v1176_v9 = vmul.f32 %v2221_v23, %v3247_v42 }
 0x2cd   : > { %v1106_v45 = vpop.xlane.xlu0 %1105  ;;  %1180 = vadd.xlane.f32.xlu1 %v1179_v47  ;;  %2232 = vpow2.f32 %v1279_v56 }
 0x2ce   : > { %1147 = vadd.xlane.f32.xlu0 %v1146_v55  ;;  %v3284_v61 = vsub.f32 %v3185_v22, %v1106_v45  ;;  %2234 = vpow2.f32 %v1121_v60  ;;  %v1386_v45 = vmul.f32 %v1765_v3, %v3160_v62 }
 0x2cf   : > { %v2223_v58 = vpop.eup %2222 }
 0x2d0   : > { %v2225_v63 = vpop.eup %2224  ;;  %v1298_v1 = vsel %vm1082_vm9, %v2223_v58, 0.0  ;;  %v1129_v35 = vmul.f32 1.442695, %v3284_v61  ;;  %v1404_v48 = vsel %vm1082_vm9, %v1386_v45, 0.0 }
 0x2d1   : > { %v3286_v0 = vpop.xlane.xlu0 %1245  ;;  %1192 = vadd.xlane.f32.xlu1 %v1191_v13  ;;  %v1286_v22 = vsel %vm1082_vm9, %v2225_v63, 0.0  ;;  %v2227_v38 = vpop.eup %2226 }
 0x2d2   : > { %1299 = vadd.xlane.f32.xlu0 %v1298_v1  ;;  %v1262_v11 = vsub.f32 %v3195_v27, %v3286_v0  ;;  %2236 = vpow2.f32 %v1129_v35  ;;  %v1137_v26 = vsel %vm1082_vm9, %v2227_v38, 0.0  ;;  %v1194_v27 = vsel %vm1082_vm9, %v1176_v9, 0.0 }
 0x2d3   : > { %v2229_v20 = vpop.eup %2228  ;;  %v1173_v59 = vmul.f32 %v2227_v38, %v3259_v49  ;;  %v3344_v35 = vshrl.u32 %v1331_v10, 7 }
 0x2d4   : > { %v1273_v4 = vmul.f32 1.442695, %v1262_v11  ;;  %v2231_v5 = vpop.eup %2230  ;;  %v1149_v42 = vsel %vm1082_vm9, %v2229_v20, 0.0  ;;  %v1177_v39 = vmul.f32 %v2229_v20, %v3266_v33  ;;  %v1356_v33 = vpop.permute.xlu1 %1355  ;;  %v3346_v11 = vstv %s1769_s7 }
 0x2d5   : > { %v3295_v14 = vpop.xlane.xlu0 %1257  ;;  %1287 = vadd.xlane.f32.xlu1 %v1286_v22  ;;  %v1289_v17 = vsel %vm1082_vm9, %v2231_v5, 0.0  ;;  %v1185_v46 = vsel %vm1082_vm9, %v1173_v59, 0.0  ;;  %vm1364_vm1 = vcmp.eq.s32.totalorder %v3208_v29, %v1356_v33  ;;  %v1434_v22 = vadd.s32 %v3346_v11, %v3344_v35 }
 0x2d6   : > { %1183 = vadd.xlane.f32.xlu0 %v1182_v15  ;;  %v1266_v19 = vsub.f32 %v3201_v28, %v3295_v14  ;;  %2238 = vpow2.f32 %v1273_v4  ;;  %v1197_v23 = vsel %vm1082_vm9, %v1177_v39, 0.0  ;;  %v1767_v58 = vsel %vm1364_vm1, 1.0, %v2449_v31 }
 0x2d7   : > { %v2233_v53 = vpop.eup %2232  ;;  %v1388_v60 = vmul.f32 %v1767_v58, %v3201_v28  ;;  %v1429_v38 = vadd.s32 32, %v3344_v35  ;;  %vm1442_vm2 = vcmp.lt.s32.totalorder %v1434_v22, 250  ;;  %v1430_v59 = vadd.s32 40, %v3344_v35 }
 0x2d8   : > { %v1281_v24 = vmul.f32 1.442695, %v1266_v19  ;;  %v2235_v30 = vpop.eup %2234  ;;  %v1301_v16 = vsel %vm1082_vm9, %v2233_v53, 0.0  ;;  %v1770_v6 = vsel %vm1442_vm2, 1.0, %v2449_v31 }
 0x2d9   : > { %1138 = vadd.xlane.f32.xlu1 %v1137_v26  ;;  %v1140_v54 = vsel %vm1082_vm9, %v2235_v30, 0.0  ;;  %v1174_v55 = vmul.f32 %v2235_v30, %v3278_v8  ;;  %v1410_v13 = vsel %vm1082_vm9, %v1388_v60, 0.0  ;;  %v1438_v10 = vadd.s32 %v3346_v11, %v1429_v38 }
 0x2da   : > { %1195 = vadd.xlane.f32.xlu0 %v1194_v27  ;;  %2240 = vpow2.f32 %v1281_v24  ;;  %v1426_v27 = vadd.s32 8, %v3344_v35  ;;  %v1439_v45 = vadd.s32 %v3346_v11, %v1430_v59 }
 0x2db   : > { %vm1446_vm3 = vcmp.lt.s32.totalorder %v1438_v10, 250 }
 0x2dc   : > { %v2237_v21 = vpop.eup %2236  ;;  %v1353_v32 = vpop.permute.xlu0 %1352  ;;  %vm1447_vm6 = vcmp.lt.s32.totalorder %v1439_v45, 250 }
 0x2dd   : > { %1150 = vadd.xlane.f32.xlu1 %v1149_v42  ;;  %v1152_v36 = vsel %vm1082_vm9, %v2237_v21, 0.0  ;;  %vm1363_vm15 = vcmp.eq.s32.totalorder %v3208_v29, %v1353_v32  ;;  %v1178_v56 = vmul.f32 %v2237_v21, %v3284_v61 }
 0x2de   : > { %1290 = vadd.xlane.f32.xlu0 %v1289_v17  ;;  %v1766_v40 = vsel %vm1363_vm15, 1.0, %v2449_v31 }
 0x2df   : > { %v1387_v44 = vmul.f32 %v1766_v40, %v3182_v18  ;;  %v1188_v18 = vsel %vm1082_vm9, %v1174_v55, 0.0  ;;  %v1200_v62 = vsel %vm1082_vm9, %v1178_v56, 0.0  ;;  %v3358_v40 = vsel %vm1446_vm3, 1.0, %v2449_v31 }
 0x2e0   : > { %v2239_v37 = vpop.eup %2238 }
 0x2e1   : > { %1302 = vadd.xlane.f32.xlu1 %v1301_v16  ;;  %v1292_v43 = vsel %vm1082_vm9, %v2239_v37, 0.0  ;;  %v1407_v47 = vsel %vm1082_vm9, %v1387_v44, 0.0 }
 0x2e2   : > { %1141 = vadd.xlane.f32.xlu0 %v1140_v54  ;;  %v1499_v54 = vld [vmem:[#allocation3] sm:$0xff] }
 0x2e4   : > { %v2241_v49 = vpop.eup %2240 }
 0x2e5   : > { %1402 = vadd.xlane.f32.xlu1 %v1401_v51  ;;  %v1304_v50 = vsel %vm1082_vm9, %v2241_v49, 0.0  ;;  %v1435_v51 = vadd.s32 %v3346_v11, %v1426_v27  ;;  %v1504_v27 = vld [vmem:[#allocation3 + $0x28] sm:$0xff] }
 0x2e6   : > { %1153 = vadd.xlane.f32.xlu0 %v1152_v36 }
 0x2e7   : > { %vm1443_vm5 = vcmp.lt.s32.totalorder %v1435_v51, 250 }
 0x2e8   : > { %v1771_v58 = vsel %vm1443_vm5, 1.0, %v2449_v31 }
 0x2e9   : > { %1186 = vadd.xlane.f32.xlu1 %v1185_v46 }
 0x2ea   : > { %1293 = vadd.xlane.f32.xlu0 %v1292_v43  ;;  %v1466_v43 = vld [vmem:[#allocation2] sm:$0xff] }
 0x2ed   : > { %1198 = vadd.xlane.f32.xlu1 %v1197_v23 }
 0x2ee   : > { %1305 = vadd.xlane.f32.xlu0 %v1304_v50  ;;  %v1503_v50 = vld [vmem:[#allocation3 + $0x20] sm:$0xff] }
 0x2f1   : > { %1408 = vadd.xlane.f32.xlu1 %v1407_v47 }
 0x2f2   : > { %1405 = vadd.xlane.f32.xlu0 %v1404_v48 }
 0x2f6   : > { %1189 = vadd.xlane.f32.xlu0 %v1188_v18 }
 0x2fa   : > { %1201 = vadd.xlane.f32.xlu0 %v1200_v62 }
 0x2fd   : > { %v1391_v8 = vpop.xlane.xlu1 %1390 }
 0x2fe   : > { %1411 = vadd.xlane.f32.xlu0 %v1410_v13 }
 0x301   : > { %v3338_v29 = vpop.xlane.xlu1 %1396 }
 0x309   : > { %v3336_v63 = vpop.xlane.xlu0 %1393 }
 0x30d   : > { %v3340_v1 = vpop.xlane.xlu0 %1399 }
 0x34e   : > { %v1133_v7 = vpop.xlane.xlu1 %1132 }
 0x34f   : > { %2242 = vlog2.f32 %v1133_v7 }
 0x350   : > { %2244 = vrcp.f32 %v1133_v7  ;;  %v1285_v61 = vpop.xlane.xlu0 %1284 }
 0x351   : > { %2246 = vlog2.f32 %v1285_v61  ;;  %v1500_v61 = vld [vmem:[#allocation3 + $0x8] sm:$0xff] }
 0x352   : > { %v1145_v28 = vpop.xlane.xlu1 %1144 }
 0x353   : > { %2248 = vlog2.f32 %v1145_v28 }
 0x354   : > { %2250 = vrcp.f32 %v1145_v28 }
 0x356   : > { %v1297_v15 = vpop.xlane.xlu1 %1296 }
 0x357   : > { %v1136_v9 = vpop.xlane.xlu0 %1135 }
 0x358   : > { %2252 = vlog2.f32 %v1136_v9 }
 0x359   : > { %v2243_v4 = vpop.eup %2242  ;;  %2254 = vrcp.f32 %v1136_v9  ;;  %v3367_v9 = vsel %vm1447_vm6, 1.0, %v2449_v31 }
 0x35a   : > { %v2245_v19 = vpop.eup %2244  ;;  %v1156_v26 = vmul.f32 0.6931472, %v2243_v4  ;;  %v1181_v20 = vpop.xlane.xlu1 %1180 }
 0x35b   : > { %v2247_v5 = vpop.eup %2246  ;;  %v1211_v24 = vmul.f32 %v2245_v19, %v1181_v20  ;;  %v1148_v42 = vpop.xlane.xlu0 %1147 }
 0x35c   : > { %v1308_v53 = vmul.f32 0.6931472, %v2247_v5  ;;  %2256 = vlog2.f32 %v1148_v42 }
 0x35d   : > { %v2249_v17 = vpop.eup %2248  ;;  %v1219_v30 = vsub.f32 %v1156_v26, %v1211_v24  ;;  %2258 = vrcp.f32 %v1148_v42 }
 0x35e   : > { %v2251_v16 = vpop.eup %2250  ;;  %v1323_v41 = vadd.f32 %v1308_v53, %v3231_v57  ;;  %v1164_v21 = vmul.f32 0.6931472, %v2249_v17  ;;  %v1193_v32 = vpop.xlane.xlu1 %1192  ;;  %2260 = vlog2.f32 %v1297_v15  ;;  %v1427_v53 = vadd.s32 16, %v3344_v35 }
 0x35f   : > { %v1507_v36 = vmul.f32 %v1770_v6, %v1219_v30  ;;  %v1215_v37 = vmul.f32 %v2251_v16, %v1193_v32  ;;  %v1300_v46 = vpop.xlane.xlu0 %1299  ;;  %v1431_v32 = vadd.s32 48, %v3344_v35 }
 0x360   : > { %v1413_v39 = vsub.f32 %v1323_v41, %v1391_v8 }
 0x361   : > { %v1515_v49 = vadd.f32 %v1507_v36, %v1499_v54  ;;  %v1223_v3 = vsub.f32 %v1164_v21, %v1215_v37  ;;  %v1436_v21 = vadd.s32 %v3346_v11, %v1427_v53  ;;  %v1467_v36 = vld [vmem:[#allocation2 + $0x8] sm:$0xff] }
 0x362   : > { %v2253_v57 = vpop.eup %2252  ;;  %v1474_v23 = vmul.f32 %v1770_v6, %v1413_v39  ;;  %v1288_v44 = vpop.xlane.xlu1 %1287 }
 0x363   : > { %v2255_v33 = vpop.eup %2254  ;;  %1523 = vst.msk [vmem:[#allocation3] sm:$0xff] %vm1490_vm4, %v1515_v49  ;;  %2262 = vlog2.f32 %v1288_v44  ;;  %v1158_v47 = vmul.f32 0.6931472, %v2253_v57  ;;  %v1184_v48 = vpop.xlane.xlu0 %1183  ;;  %v1511_v55 = vmul.f32 %v3358_v40, %v1223_v3  ;;  %v1470_v49 = vld [vmem:[#allocation2 + $0x20] sm:$0xff]  ;;  %vm1444_vm7 = vcmp.lt.s32.totalorder %v1436_v21, 250 }
 0x364   : > { %v1482_v18 = vadd.f32 %v1474_v23, %v1466_v43  ;;  %v1212_v56 = vmul.f32 %v2255_v33, %v1184_v48  ;;  %v1440_v57 = vadd.s32 %v3346_v11, %v1431_v32 }
 0x365   : > { %v1519_v62 = vadd.f32 %v1511_v55, %v1503_v50 }
 0x366   : > { %v2257_v60 = vpop.eup %2256  ;;  %1491 = vst.msk [vmem:[#allocation2] sm:$0xff] %vm1490_vm4, %v1482_v18  ;;  %v1220_v13 = vsub.f32 %v1158_v47, %v1212_v56  ;;  %v1139_v8 = vpop.xlane.xlu1 %1138  ;;  %v1772_v18 = vsel %vm1444_vm7, 1.0, %v2449_v31  ;;  %vm1448_vm8 = vcmp.lt.s32.totalorder %v1440_v57, 250 }
 0x367   : > { %v2259_v7 = vpop.eup %2258  ;;  %v1166_v28 = vmul.f32 0.6931472, %v2257_v60  ;;  %v1196_v22 = vpop.xlane.xlu0 %1195  ;;  %1527 = vst.msk [vmem:[#allocation3 + $0x20] sm:$0xff] %vm1490_vm4, %v1519_v62  ;;  %2264 = vlog2.f32 %v1139_v8 }
 0x368   : > { %v1508_v38 = vmul.f32 %v1771_v58, %v1220_v13  ;;  %v1216_v15 = vmul.f32 %v2259_v7, %v1196_v22  ;;  %v2261_v4 = vpop.eup %2260  ;;  %2266 = vlog2.f32 %v1300_v46 }
 0x369   : > { %2268 = vrcp.f32 %v1139_v8  ;;  %v1316_v42 = vmul.f32 0.6931472, %v2261_v4  ;;  %v1501_v8 = vld [vmem:[#allocation3 + $0x10] sm:$0xff] }
 0x36a   : > { %v1516_v10 = vadd.f32 %v1508_v38, %v1500_v61  ;;  %v1224_v19 = vsub.f32 %v1166_v28, %v1216_v15  ;;  %v1151_v26 = vpop.xlane.xlu1 %1150  ;;  %v1428_v61 = vadd.s32 24, %v3344_v35 }
 0x36b   : > { %v1291_v20 = vpop.xlane.xlu0 %1290  ;;  %v1327_v54 = vadd.f32 %v1316_v42, %v3236_v2 }
 0x36c   : > { %1524 = vst.msk [vmem:[#allocation3 + $0x8] sm:$0xff] %vm1490_vm4, %v1516_v10  ;;  %v1512_v5 = vmul.f32 %v3367_v9, %v1224_v19  ;;  %2270 = vlog2.f32 %v1291_v20  ;;  %v1776_v19 = vsel %vm1448_vm8, 1.0, %v2449_v31  ;;  %v1437_v53 = vadd.s32 %v3346_v11, %v1428_v61 }
 0x36d   : > { %v2263_v24 = vpop.eup %2262  ;;  %2272 = vlog2.f32 %v1151_v26 }
 0x36e   : > { %v1310_v6 = vmul.f32 0.6931472, %v2263_v24  ;;  %v1303_v17 = vpop.xlane.xlu1 %1302  ;;  %v1520_v30 = vadd.f32 %v1512_v5, %v1504_v27  ;;  %v1505_v5 = vld [vmem:[#allocation3 + $0x30] sm:$0xff]  ;;  %vm1445_vm9 = vcmp.lt.s32.totalorder %v1437_v53, 250 }
 0x36f   : > { %2274 = vlog2.f32 %v1303_v17  ;;  %v1142_v16 = vpop.xlane.xlu0 %1141 }
 0x370   : > { %v1324_v41 = vadd.f32 %v1310_v6, %v3244_v12  ;;  %2276 = vrcp.f32 %v1151_v26  ;;  %1528 = vst.msk [vmem:[#allocation3 + $0x28] sm:$0xff] %vm1490_vm4, %v1520_v30  ;;  %v1432_v6 = vadd.s32 56, %v3344_v35 }
 0x371   : > { %v2265_v39 = vpop.eup %2264  ;;  %2278 = vlog2.f32 %v1142_v16 }
 0x372   : > { %v1414_v51 = vsub.f32 %v1324_v41, %v3336_v63  ;;  %v1403_v59 = vpop.xlane.xlu1 %1402  ;;  %v2267_v3 = vpop.eup %2266  ;;  %v1160_v63 = vmul.f32 0.6931472, %v2265_v39  ;;  %v1441_v35 = vadd.s32 %v3346_v11, %v1432_v6 }
 0x373   : > { %v1417_v37 = vsub.f32 %v1327_v54, %v1403_v59  ;;  %v1154_v46 = vpop.xlane.xlu0 %1153  ;;  %v2269_v2 = vpop.eup %2268  ;;  %v1318_v62 = vmul.f32 0.6931472, %v2267_v3 }
 0x374   : > { %v1475_v43 = vmul.f32 %v1771_v58, %v1414_v51  ;;  %v1471_v51 = vld [vmem:[#allocation2 + $0x28] sm:$0xff]  ;;  %vm1449_vm10 = vcmp.lt.s32.totalorder %v1441_v35, 250 }
 0x375   : > { %v1478_v12 = vmul.f32 %v3358_v40, %v1417_v37  ;;  %v1328_v42 = vadd.f32 %v1318_v62, %v3252_v52 }
 0x376   : > { %v1483_v23 = vadd.f32 %v1475_v43, %v1467_v36  ;;  %v1187_v44 = vpop.xlane.xlu1 %1186  ;;  %v2271_v50 = vpop.eup %2270 }
 0x377   : > { %v1486_v45 = vadd.f32 %v1478_v12, %v1470_v49  ;;  %v1213_v33 = vmul.f32 %v2269_v2, %v1187_v44  ;;  %v1294_v47 = vpop.xlane.xlu0 %1293  ;;  %v2273_v48 = vpop.eup %2272  ;;  %v1312_v55 = vmul.f32 0.6931472, %v2271_v50  ;;  %v1773_v2 = vsel %vm1445_vm9, 1.0, %v2449_v31 }
 0x378   : > { %1492 = vst.msk [vmem:[#allocation2 + $0x8] sm:$0xff] %vm1490_vm4, %v1483_v23  ;;  %2280 = vlog2.f32 %v1294_v47  ;;  %v1168_v22 = vmul.f32 0.6931472, %v2273_v48 }
 0x379   : > { %v2275_v40 = vpop.eup %2274  ;;  %2282 = vrcp.f32 %v1142_v16  ;;  %1495 = vst.msk [vmem:[#allocation2 + $0x20] sm:$0xff] %vm1490_vm4, %v1486_v45  ;;  %v1221_v56 = vsub.f32 %v1160_v63, %v1213_v33  ;;  %v1325_v60 = vadd.f32 %v1312_v55, %v3261_v25  ;;  %v1468_v25 = vld [vmem:[#allocation2 + $0x10] sm:$0xff]  ;;  %v1502_v45 = vld [vmem:[#allocation3 + $0x18] sm:$0xff] }
 0x37a   : > { %v2277_v58 = vpop.eup %2276  ;;  %v1320_v13 = vmul.f32 0.6931472, %v2275_v40  ;;  %v1199_v7 = vpop.xlane.xlu1 %1198  ;;  %2284 = vlog2.f32 %v1154_v46  ;;  %v1472_v16 = vld [vmem:[#allocation2 + $0x30] sm:$0xff]  ;;  %v1469_v33 = vld [vmem:[#allocation2 + $0x18] sm:$0xff]  ;;  %v1777_v40 = vsel %vm1449_vm10, 1.0, %v2449_v31  ;;  %v1535_v31 = vld [vmem:[#allocation2] sm:$0xff] (!%p1778_p2) }
 0x37b   : > { %v1509_v28 = vmul.f32 %v1772_v18, %v1221_v56  ;;  %v1217_v38 = vmul.f32 %v2277_v58, %v1199_v7  ;;  %v1306_v15 = vpop.xlane.xlu0 %1305  ;;  %v1415_v4 = vsub.f32 %v1325_v60, %v3338_v29  ;;  %v2279_v54 = vpop.eup %2278  ;;  %v1506_v60 = vld [vmem:[#allocation3 + $0x38] sm:$0xff] }
 0x37c   : > { %2286 = vlog2.f32 %v1306_v15  ;;  %v1329_v10 = vadd.f32 %v1320_v13, %v3270_v34  ;;  %v1162_v49 = vmul.f32 0.6931472, %v2279_v54  ;;  %v1473_v7 = vld [vmem:[#allocation2 + $0x38] sm:$0xff] }
 0x37d   : > { %2288 = vrcp.f32 %v1154_v46  ;;  %v1517_v26 = vadd.f32 %v1509_v28, %v1501_v8  ;;  %v1225_v20 = vsub.f32 %v1168_v22, %v1217_v38  ;;  %v1476_v27 = vmul.f32 %v1772_v18, %v1415_v4 }
 0x37e   : > { %v1409_v24 = vpop.xlane.xlu1 %1408  ;;  %v1543_v4 = vsel (!%p1778_p2), %vm1490_vm4, %v1535_v31, 0.0 }
 0x37f   : > { %1525 = vst.msk [vmem:[#allocation3 + $0x10] sm:$0xff] %vm1490_vm4, %v1517_v26  ;;  %v1513_v29 = vmul.f32 %v1776_v19, %v1225_v20  ;;  %v1419_v34 = vsub.f32 %v1329_v10, %v1409_v24  ;;  %v1406_v17 = vpop.xlane.xlu0 %1405  ;;  %v1484_v30 = vadd.f32 %v1476_v27, %v1468_v25  ;;  %v1568_v20 = vld [vmem:[#allocation3] sm:$0xff] (!%p1778_p2) }
 0x380   : > { %v1418_v41 = vsub.f32 %v1328_v42, %v1406_v17  ;;  %v1539_v25 = vld [vmem:[#allocation2 + $0x20] sm:$0xff] (!%p1778_p2)  ;;  %v1576_v53 = vsel (!%p1778_p2), %vm1490_vm4, %v1568_v20, 0.0 }
 0x381   : > { %v1521_v21 = vadd.f32 %v1513_v29, %v1505_v5  ;;  %v1480_v32 = vmul.f32 %v1776_v19, %v1419_v34  ;;  %1493 = vst.msk [vmem:[#allocation2 + $0x10] sm:$0xff] %vm1490_vm4, %v1484_v30  ;;  %v1569_v5 = vld [vmem:[#allocation3 + $0x8] sm:$0xff] (!%p1778_p2)  ;;  %v1550_v30 = vsel (!%p1778_p2), %vm1490_vm4, %v1539_v25, 0.0 }
 0x382   : > { %v2281_v59 = vpop.eup %2280  ;;  %v1479_v52 = vmul.f32 %v3367_v9, %v1418_v41  ;;  %v1577_v34 = vsel (!%p1778_p2), %vm1490_vm4, %v1569_v5, 0.0 }
 0x383   : > { %v2283_v36 = vpop.eup %2282  ;;  %v1314_v37 = vmul.f32 0.6931472, %v2281_v59  ;;  %1529 = vst.msk [vmem:[#allocation3 + $0x30] sm:$0xff] %vm1490_vm4, %v1521_v21  ;;  %v1488_v46 = vadd.f32 %v1480_v32, %v1472_v16  ;;  %v1190_v39 = vpop.xlane.xlu0 %1189  ;;  %v1572_v16 = vld [vmem:[#allocation3 + $0x20] sm:$0xff] (!%p1778_p2)  ;;  %v1578_v41 = vadd.f32 (!%p1778_p2), %v1577_v34, %v1576_v53  ;;  %v1573_v59 = vld [vmem:[#allocation3 + $0x28] sm:$0xff] (!%p1778_p2) }
 0x384   : > { %v1487_v43 = vadd.f32 %v1479_v52, %v1471_v51  ;;  %v1214_v3 = vmul.f32 %v2283_v36, %v1190_v39  ;;  %v2285_v12 = vpop.eup %2284 }
 0x385   : > { %v1326_v57 = vadd.f32 %v1314_v37, %v3286_v0  ;;  %1497 = vst.msk [vmem:[#allocation2 + $0x30] sm:$0xff] %vm1490_vm4, %v1488_v46  ;;  %v1170_v48 = vmul.f32 0.6931472, %v2285_v12  ;;  %v1583_v37 = vsel (!%p1778_p2), %vm1490_vm4, %v1572_v16, 0.0 }
 0x386   : > { %v2287_v9 = vpop.eup %2286  ;;  %1496 = vst.msk [vmem:[#allocation2 + $0x28] sm:$0xff] %vm1490_vm4, %v1487_v43  ;;  %v1222_v11 = vsub.f32 %v1162_v49, %v1214_v3  ;;  %v1570_v24 = vld [vmem:[#allocation3 + $0x10] sm:$0xff] (!%p1778_p2)  ;;  %v1585_v3 = vsel (!%p1778_p2), %vm1490_vm4, %v1573_v59, 0.0 }
 0x387   : > { %v2289_v23 = vpop.eup %2288  ;;  %v1416_v44 = vsub.f32 %v1326_v57, %v3340_v1  ;;  %v1322_v50 = vmul.f32 0.6931472, %v2287_v9  ;;  %v1202_v63 = vpop.xlane.xlu0 %1201  ;;  %v1579_v17 = vsel (!%p1778_p2), %vm1490_vm4, %v1570_v24, 0.0 }
 0x388   : > { %v1510_v47 = vmul.f32 %v1773_v2, %v1222_v11  ;;  %v1218_v55 = vmul.f32 %v2289_v23, %v1202_v63  ;;  %v1537_v38 = vld [vmem:[#allocation2 + $0x10] sm:$0xff] (!%p1778_p2)  ;;  %v1580_v52 = vadd.f32 (!%p1778_p2), %v1579_v17, %v1578_v41 }
 0x389   : > { %v1477_v0 = vmul.f32 %v1773_v2, %v1416_v44  ;;  %v1330_v18 = vadd.f32 %v1322_v50, %v3295_v14  ;;  %v1536_v14 = vld [vmem:[#allocation2 + $0x8] sm:$0xff] (!%p1778_p2)  ;;  %v1546_v19 = vsel (!%p1778_p2), %vm1490_vm4, %v1537_v38, 0.0 }
 0x38a   : > { %v1518_v56 = vadd.f32 %v1510_v47, %v1502_v45  ;;  %v1226_v58 = vsub.f32 %v1170_v48, %v1218_v55  ;;  %v1544_v10 = vsel (!%p1778_p2), %vm1490_vm4, %v1536_v14, 0.0  ;;  %v1574_v39 = vld [vmem:[#allocation3 + $0x30] sm:$0xff] (!%p1778_p2) }
 0x38b   : > { %v1485_v62 = vadd.f32 %v1477_v0, %v1469_v33  ;;  %v1412_v13 = vpop.xlane.xlu0 %1411  ;;  %v1545_v26 = vadd.f32 (!%p1778_p2), %v1544_v10, %v1543_v4  ;;  %v1587_v11 = vsel (!%p1778_p2), %vm1490_vm4, %v1574_v39, 0.0 }
 0x38c   : > { %1526 = vst.msk [vmem:[#allocation3 + $0x18] sm:$0xff] %vm1490_vm4, %v1518_v56  ;;  %v1514_v1 = vmul.f32 %v1777_v40, %v1226_v58  ;;  %v1420_v8 = vsub.f32 %v1330_v18, %v1412_v13  ;;  %1534 = sbr.rel (%p1778_p2) target bundleno = 1144 (0x478), region = 56  ;;  %v1541_v54 = vld [vmem:[#allocation2 + $0x30] sm:$0xff] (!%p1778_p2) }
 0x38d   : > { %1494 = vst.msk [vmem:[#allocation2 + $0x18] sm:$0xff] %vm1490_vm4, %v1485_v62  ;;  %v1540_v6 = vld [vmem:[#allocation2 + $0x28] sm:$0xff] (!%p1778_p2)  ;;  %v1547_v29 = vadd.f32 (!%p1778_p2), %v1546_v19, %v1545_v26  ;;  %v1554_v46 = vsel (!%p1778_p2), %vm1490_vm4, %v1541_v54, 0.0 }
 0x38e   : > { %v1522_v61 = vadd.f32 %v1514_v1, %v1506_v60  ;;  %v1481_v28 = vmul.f32 %v1777_v40, %v1420_v8  ;;  %v1552_v51 = vsel (!%p1778_p2), %vm1490_vm4, %v1540_v6, 0.0 }
 0x390   : > { %1530 = vst.msk [vmem:[#allocation3 + $0x38] sm:$0xff] %vm1490_vm4, %v1522_v61  ;;  %v1489_v22 = vadd.f32 %v1481_v28, %v1473_v7 }
 0x392   : > { %1498 = vst.msk [vmem:[#allocation2 + $0x38] sm:$0xff] %vm1490_vm4, %v1489_v22 }
 0x393   : > { %v1571_v42 = vld [vmem:[#allocation3 + $0x18] sm:$0xff] }
 0x394   : > { %v1538_v15 = vld [vmem:[#allocation2 + $0x18] sm:$0xff]  ;;  %v1581_v32 = vsel %vm1490_vm4, %v1571_v42, 0.0 }
 0x395   : > { %v1548_v27 = vsel %vm1490_vm4, %v1538_v15, 0.0  ;;  %v1582_v43 = vadd.f32 %v1581_v32, %v1580_v52 }
 0x396   : > { %v1549_v21 = vadd.f32 %v1548_v27, %v1547_v29 }
 0x397   : > { %v1575_v57 = vld [vmem:[#allocation3 + $0x38] sm:$0xff]  ;;  %v1584_v2 = vadd.f32 %v1583_v37, %v1582_v43 }
 0x398   : > { %v1551_v36 = vadd.f32 %v1550_v30, %v1549_v21  ;;  %v1589_v50 = vsel %vm1490_vm4, %v1575_v57, 0.0 }
 0x399   : > { %v1542_v35 = vld [vmem:[#allocation2 + $0x38] sm:$0xff]  ;;  %v1586_v23 = vadd.f32 %v1585_v3, %v1584_v2 }
 0x39a   : > { %v1553_v49 = vadd.f32 %v1552_v51, %v1551_v36  ;;  %v1556_v12 = vsel %vm1490_vm4, %v1542_v35, 0.0 }
 0x39b   : > { %v1588_v45 = vadd.f32 %v1587_v11, %v1586_v23 }
 0x39c   : > { %v1555_v9 = vadd.f32 %v1554_v46, %v1553_v49 }
 0x39d   : > { %v1590_v63 = vadd.f32 %v1589_v50, %v1588_v45 }
 0x39e   : > { %v1557_v44 = vadd.f32 %v1556_v12, %v1555_v9 }
 0x3a0   : > { %1558 = vadd.xlane.f32.xlu0 %v1557_v44 }
 0x3a4   : > { %1591 = vadd.xlane.f32.xlu0 %v1590_v63 }
 0x42d   : > { %v1559_v33 = vpop.xlane.xlu0 %1558 }
 0x42e   : > { %v1560_v47 = vrot.slane %v1559_v33, 4 }
 0x430   : > { %v1561_v48 = vadd.f32 %v1560_v47, %v1559_v33 }
 0x431   : > { %v1592_v55 = vpop.xlane.xlu0 %1591 }
 0x432   : > { %v1562_v0 = vrot.slane %v1561_v48, 2  ;;  %v1593_v18 = vrot.slane %v1592_v55, 4 }
 0x434   : > { %v1594_v40 = vadd.f32 %v1593_v18, %v1592_v55  ;;  %v1563_v56 = vadd.f32 %v1562_v0, %v1561_v48 }
 0x436   : > { %v1595_v58 = vrot.slane %v1594_v40, 2  ;;  %v1564_v62 = vrot.slane %v1563_v56, 1 }
 0x438   : > { %v1596_v60 = vadd.f32 %v1595_v58, %v1594_v40  ;;  %v1565_v13 = vadd.f32 %v1564_v62, %v1563_v56 }
 0x43a   : > { %2065 = vpush %v1565_v13  ;;  %v1597_v1 = vrot.slane %v1596_v60, 1 }
 0x43c   : > { %v1598_v8 = vadd.f32 %v1597_v1, %v1596_v60 }
 0x43e   : > { %2067 = vpush %v1598_v8 }
 0x46b   : > { %s2066_s29 = spop %2065 }
 0x46c   : > { %s1567_s9 = smul.f32 0.004, %s2066_s29 }
 0x46f   : > { %s2068_s22 = spop %2067 }
 0x470   : > { %s1600_s15 = smul.f32 0.004, %s2068_s22 }
 0x472   : > { %s1601_s14 = smul.f32 0.03, %s1600_s15 }
 0x474   : > { %s1602_s18 = sadd.f32 %s1601_s14, %s1567_s9 }
 0x476   : > { %v1603_v7 = vstv %s1602_s18 }
 0x477   : > { %1604 = vst [vmem:[%s2670_s0] sm:$0x1] %v1603_v7 }
 0x478 PF: > { %s1779_s1 = sshll.u32 %s2430_s30, 4  ;;  %s1618_s3 = sshll.u32 %s2670_s0, 4  ;;  %s1619_s3 = int_to_ptr.vmem [resolvable:$true] %s1618_s3 }
 0x479   : > { %s3430_s21 = scalar_lea.hbm %s3495_s6, %s1779_s1  ;;  %s3529_s16 = sand.u32 1, %s2406_s24  }
 0x47a   : > { %s1606_s20 = scalar_lea.sflag [#allocation7], %s3529_s16  ;;  %s2320_s5 = scalar_lea.vmem %s1619_s3, 16 }
 0x47b   : > { %p2321_p3 = scmp.ne.s32.totalorder %s1619_s3, %s2320_s5  ;;  %p3530_p0 = scmp.ne.s32.totalorder %s3513_s10, 0 }
 0x47c   : > { %s2450_s13 = smov [#allocation8]  }
 0x47d   : > { %p2322_p1 = pnand %p2321_p3, %p3530_p0  ;;  %s2324_s17 = sshll.u32 %s2450_s13, 4  ;;  %s2325_s17 = int_to_ptr.vmem [resolvable:$false] %s2324_s17 }
 0x47e   : > { %s2326_s12 = scalar_lea.vmem %s2325_s17, 32  ;;  %p2327_p6 = scmp.lt.s32.totalorder %s1619_s3, %s2325_s17 }
 0x47f   : > { %p2323_p4 = pneg %p2322_p1  ;;  %p2328_p9 = scmp.lt.s32.totalorder %s2326_s12, %s2320_s5 }
 0x481   : > { %p2329_p10 = por %p2328_p9, %p2327_p6 }
 0x483   : > { %p2330_p11 = pnand %p2329_p10, %p2323_p4 }
 0x485   : > { %2333 = shalt.err (!%p2330_p11)
}
 0x486   : > { %s2334_s0 = scalar_lea.hbm %s3430_s21, 16  ;;  %s2338_s29 = scalar_lea.hbm %s3495_s6, 32 }
 0x487   : > { %p2335_p5 = scmp.ne.s32.totalorder %s3430_s21, %s2334_s0  ;;  %p2339_p12 = scmp.lt.u32.totalorder %s3430_s21, %s3495_s6 }
 0x488   : > { %p2340_p7 = scmp.lt.u32.totalorder %s2338_s29, %s2334_s0  ;;  %p2342_p3 = scmp.lt.u32.totalorder %s2334_s0, %s3430_s21 }
 0x489   : > { %p2336_p8 = pnand %p2335_p5, %p3530_p0 }
 0x48a   : > { %p2341_p2 = por %p2340_p7, %p2339_p12 }
 0x48b   : > { %p2337_p13 = pneg %p2336_p8 }
 0x48c   : > { %p2343_p1 = por %p2342_p3, %p2341_p2 }
 0x48e   : > { %p2344_p4 = pnand %p2343_p1, %p2337_p13 }
 0x490   : > { %2347 = shalt.err (!%p2344_p4)
}
 0x491   : > { %2071 = dma.vmem_to_hbm [thread:$0]  (%p3530_p0), %s1619_s3, 16, %s3430_s21, %s1606_s20  }
 0x492 PF: > { %p2082_p6 = scmp.ge.s32.totalorder %s2442_s8, 2  ;;  %s1630_s9 = sand.u32 1, %s2402_s23  }
 0x493   : > { %p3531_p9 = scmp.ne.s32.totalorder %s3515_s19, 0  ;;  %s1631_s14 = scalar_lea.sflag [#allocation7], %s1630_s9 }
 0x495   : > { %p2078_p10 = pnand %p2082_p6, %p3531_p9 }
 0x497   : > { %2397 = dma.done.wait (!%p2078_p10), %s1631_s14, 16  }
 0x498   : > { %2399 = vsyncadd (!%p2078_p10), %s1631_s14, 4294967280  ;;  %s23_s8 = sadd.s32 1, %s2442_s8   ;;  %s3532_s10 = sld [smem:[#allocation15_spill]] }
 0x499   : > { %p20_p11 = scmp.ge.s32.totalorder %s23_s8, 6   ;;  %s3533_s29 = sld [smem:[#allocation11_spill]] }
 0x49a   : > { %s3534_s30 = sld [smem:[#allocation12_spill]]  ;;  %s3535_s5 = sld [smem:[#allocation13_spill]] }
 0x49b   : > { %s3536_s7 = sld [smem:[#allocation14_spill]]  ;;  %s3537_s23 = smov %s2406_s24 }
 0x49c   : > { %s3538_s24 = smov %s2410_s25  ;;  %s3539_s25 = smov %s2577_s26 }
 0x49d   : > { %s3540_s26 = smov %s2418_s27  ;;  %s3541_s27 = smov %s2422_s28 }
 0x49e   : > { %s3542_s28 = smov %s3532_s10  ;;  %22 = sbr.rel (!%p20_p11) target bundleno = 15 (0xf), region = 106 }
 0x4a5   :  { %1635 = vsyncpa [#allocation6], 1 }
 0x4a6   :  { %1637 = vsyncpa [#allocation6 + $0x1], 1 }
 0x4a7   :  { %1638 = vsyncpa [#allocation7], 1 }
 0x4a8   :  { %1640 = vsyncpa [#allocation7 + $0x1], 1 }

</bundles_post_ra>
